<compile_context>
chip_gen: v7x
topology: tpu7x:2x2x1
jax: 0.10.0
libtpu: 0.0.40
codegen_flags: <defaults>
</compile_context>

<pallas_src>
import functools
import math

import jax
import jax.numpy as jnp
from jax.experimental import pallas as pl
from jax.experimental.pallas import tpu as pltpu


def _bert_stack_kernel(num_heads, eps,
                       x_ref,                       # [BS, H] f32 layer-0 activations
                       vlen_ref,                    # [nh*B, 1, 1] i32 valid lens / row
                       wqkv_ref, bqkv_ref,          # [H, 3H] bf16 / [1, 3H] f32
                       wo_ref, bo_ref,              # [H, H]  bf16 / [1, H]  f32
                       w1_ref, b1_ref,              # [H, Fh] bf16 / [1, Fh] f32
                       w2_ref, b2_ref,              # [Fh, H] bf16 / [1, H]  f32
                       g1_ref, be1_ref, g2_ref, be2_ref,   # [S, H] f32 LayerNorm affine
                       out_ref,                     # [B, S, H] f32
                       act_ref):                    # VMEM scratch [BS, H] bf16 (carry)
    layer = pl.program_id(0)

    @pl.when(layer == 0)
    def _():
        act_ref[...] = x_ref[...].astype(jnp.bfloat16)

    xb = act_ref[...]                                # [BS, H] bf16
    BS, H = xb.shape
    nh = num_heads
    hd = H // nh
    S = g1_ref.shape[0]
    B = BS // S

    x_f32 = xb.astype(jnp.float32)

    # ---- fused QKV projection: one [BS,H] x [H,3H] MXU matmul ---------------
    qkv = jnp.dot(xb, wqkv_ref[...],
                  preferred_element_type=jnp.float32) + bqkv_ref[...]
    qkv = qkv.astype(jnp.bfloat16)                   # [BS, 3H]

    def split_heads(t2d):                            # [BS, H] -> [nh*B, S, hd]
        parts = [t2d[:, h * hd:(h + 1) * hd] for h in range(nh)]
        return jnp.stack(parts, axis=0).reshape(nh * B, S, hd)

    qh = split_heads(qkv[:, 0:H])
    kh = split_heads(qkv[:, H:2 * H])
    vh = split_heads(qkv[:, 2 * H:3 * H])

    # ---- batch-separated scaled dot-product attention -----------------------
    scale = 1.0 / math.sqrt(hd)
    scores = jnp.einsum('bqd,bkd->bqk', qh, kh,
                        preferred_element_type=jnp.float32) * scale   # [nh*B,S,S]

    # key mask built in-kernel from valid_lens (masked_softmax: value = -1e6)
    col = jax.lax.broadcasted_iota(jnp.int32, (nh * B, S, S), 2)
    scores = jnp.where(col < vlen_ref[...], scores, -1e6)

    m = jnp.max(scores, axis=-1, keepdims=True)
    p = jnp.exp(scores - m)
    attn = p * pl.reciprocal(jnp.sum(p, axis=-1, keepdims=True), approx=True)
    attn = attn.astype(jnp.bfloat16)

    ctx = jnp.einsum('bqk,bkd->bqd', attn, vh,
                     preferred_element_type=jnp.float32)              # [nh*B,S,hd]

    # ---- merge heads into the lane dim, single [BS,H] x [H,H] out projection
    ctx = ctx.reshape(nh, BS, hd)
    ctx_cat = jnp.concatenate([ctx[h] for h in range(nh)], axis=-1)   # [BS, H]
    attn_out = jnp.dot(ctx_cat.astype(jnp.bfloat16), wo_ref[...],
                       preferred_element_type=jnp.float32) + bo_ref[...]

    # ---- AddNorm over normalized_shape=(S, H), per batch element ------------
    def add_norm(res2d, upd2d, g_ref, b_ref):
        z = (res2d + upd2d).reshape(B, S, H)
        mu = jnp.sum(jnp.sum(z, axis=2, keepdims=True),
                     axis=1, keepdims=True) / (S * H)
        d = z - mu
        var = jnp.sum(jnp.sum(d * d, axis=2, keepdims=True),
                      axis=1, keepdims=True) / (S * H)
        zn = d * jax.lax.rsqrt(var + eps)
        return (zn * g_ref[...] + b_ref[...]).reshape(BS, H)

    y = add_norm(x_f32, attn_out, g1_ref, be1_ref)

    # ---- position-wise FFN ---------------------------------------------------
    h1 = jnp.maximum(
        jnp.dot(y.astype(jnp.bfloat16), w1_ref[...],
                preferred_element_type=jnp.float32) + b1_ref[...], 0.0)
    f = jnp.dot(h1.astype(jnp.bfloat16), w2_ref[...],
                preferred_element_type=jnp.float32) + b2_ref[...]

    y2 = add_norm(y, f, g2_ref, be2_ref)
    act_ref[...] = y2.astype(jnp.bfloat16)           # bf16 carry to next layer

    @pl.when(layer == pl.num_programs(0) - 1)
    def _():
        out_ref[...] = y2.reshape(B, S, H)           # single HBM writeback


def _stack_params(block_params):
    return {k: jnp.stack([p[k] for p in block_params], axis=0)
            for k in block_params[0]}


def bert_encoder(tokens, segments, valid_lens,
                 token_emb, segment_emb, pos_emb, block_params, num_heads,
                 eps=1e-5):
    """Full BERTEncoder forward. tokens/segments: [B, S] int32, valid_lens: [B]."""
    B, S = tokens.shape
    H = token_emb.shape[1]
    L = len(block_params)
    nh = num_heads
    BS = B * S

    # Embedding lookups + positional embedding add (plain-JAX glue).
    X = jnp.take(token_emb, tokens, axis=0) + jnp.take(segment_emb, segments, axis=0)
    X = X + pos_emb[:, :S, :]
    x2d = X.reshape(BS, H).astype(jnp.float32)

    p = _stack_params(block_params)
    Fh = p["w1"].shape[2]

    # Weight layout prep (wrapper-side, one-time): fused QKV + bf16.
    wqkv = jnp.concatenate([p["wq"], p["wk"], p["wv"]], axis=2).astype(jnp.bfloat16)
    bqkv = jnp.concatenate([p["bq"], p["bk"], p["bv"]], axis=2)
    wo = p["wo"].astype(jnp.bfloat16)
    bo = p["bo"]
    w1 = p["w1"].astype(jnp.bfloat16)
    w2 = p["w2"].astype(jnp.bfloat16)
    b1, b2 = p["b1"], p["b2"]
    g1, be1, g2, be2 = p["g1"], p["be1"], p["g2"], p["be2"]

    # Per-(head, batch) key-count thresholds: row r = h*B + b  ->  valid_lens[b].
    vlen3 = jnp.tile(valid_lens.astype(jnp.int32), nh).reshape(nh * B, 1, 1)

    def lspec(shape):   # per-layer (stacked) parameter: new block each grid step
        n = len(shape)
        return pl.BlockSpec((None,) + shape, lambda l, n=n: (l,) + (0,) * n)

    def cspec(shape):   # constant-index (resident) input
        n = len(shape)
        return pl.BlockSpec(shape, lambda l, n=n: (0,) * n)

    # VMEM budget: double-buffered streamed layer weights + transients + margin.
    w_layer = 2 * (H * 3 * H + H * H + 2 * H * Fh) + 4 * (4 * H + 2 * Fh + 4 * S * H)
    transient = 4 * (BS * 3 * H + 3 * nh * B * S * S + BS * Fh + 8 * BS * H)
    vmem_limit = int(min(120 * 1024 * 1024,
                         max(32 * 1024 * 1024, 2 * w_layer + transient + (8 << 20))))

    hd = H // nh
    flops = L * (2 * BS * H * 3 * H + 4 * nh * B * S * S * hd
                 + 2 * BS * H * H + 4 * BS * H * Fh)
    bytes_accessed = int(sum(int(a.size) * a.dtype.itemsize for a in
                             (x2d, vlen3, wqkv, bqkv, wo, bo, w1, b1, w2, b2,
                              g1, be1, g2, be2)) + B * S * H * 4)

    kernel = functools.partial(_bert_stack_kernel, num_heads, eps)
    return pl.pallas_call(
        kernel,
        out_shape=jax.ShapeDtypeStruct((B, S, H), jnp.float32),
        grid=(L,),
        in_specs=[
            cspec((BS, H)),                           # activations (layer-0 input)
            cspec((nh * B, 1, 1)),                    # valid-length thresholds
            lspec((H, 3 * H)), lspec((1, 3 * H)),     # fused Wqkv, bqkv
            lspec((H, H)), lspec((1, H)),             # Wo, bo
            lspec((H, Fh)), lspec((1, Fh)),           # FFN dense1
            lspec((Fh, H)), lspec((1, H)),            # FFN dense2
            lspec((S, H)), lspec((S, H)),             # LN1 gamma, beta
            lspec((S, H)), lspec((S, H)),             # LN2 gamma, beta
        ],
        out_specs=pl.BlockSpec((B, S, H), lambda l: (0, 0, 0)),
        scratch_shapes=[pltpu.VMEM((BS, H), jnp.bfloat16)],
        compiler_params=pltpu.CompilerParams(
            dimension_semantics=("arbitrary",),       # layer axis carries activations
            vmem_limit_bytes=vmem_limit),
        cost_estimate=pl.CostEstimate(
            flops=flops,
            transcendentals=L * nh * B * S * S,
            bytes_accessed=bytes_accessed),
    )(x2d, vlen3, wqkv, bqkv, wo, bo, w1, b1, w2, b2, g1, be1, g2, be2)


def init_block_params(key, num_steps, num_hiddens, ffn_num_hiddens):
    ks = jax.random.split(key, 6)
    scale = 0.02
    H, S, Fh = num_hiddens, num_steps, ffn_num_hiddens
    return {
        "wq": scale * jax.random.normal(ks[0], (H, H), jnp.float32),
        "bq": jnp.zeros((1, H), jnp.float32),
        "wk": scale * jax.random.normal(ks[1], (H, H), jnp.float32),
        "bk": jnp.zeros((1, H), jnp.float32),
        "wv": scale * jax.random.normal(ks[2], (H, H), jnp.float32),
        "bv": jnp.zeros((1, H), jnp.float32),
        "wo": scale * jax.random.normal(ks[3], (H, H), jnp.float32),
        "bo": jnp.zeros((1, H), jnp.float32),
        "w1": scale * jax.random.normal(ks[4], (H, Fh), jnp.float32),
        "b1": jnp.zeros((1, Fh), jnp.float32),
        "w2": scale * jax.random.normal(ks[5], (Fh, H), jnp.float32),
        "b2": jnp.zeros((1, H), jnp.float32),
        "g1": jnp.ones((S, H), jnp.float32),
        "be1": jnp.zeros((S, H), jnp.float32),
        "g2": jnp.ones((S, H), jnp.float32),
        "be2": jnp.zeros((S, H), jnp.float32),
    }


if __name__ == "__main__":
    # Small, lane/sublane-aligned shapes (H, Fh multiples of 128; S multiple of 8).
    vocab_size = 100
    num_hiddens = 128
    num_steps = 8
    num_heads = 4
    ffn_num_hiddens = 256
    num_layers = 2
    max_len = 50
    batch_size = 2

    root = jax.random.PRNGKey(0)
    k_tok, k_seg, k_pos, k_ids, k_blocks = jax.random.split(root, 5)

    token_emb = 0.02 * jax.random.normal(k_tok, (vocab_size, num_hiddens), jnp.float32)
    segment_emb = 0.02 * jax.random.normal(k_seg, (2, num_hiddens), jnp.float32)
    pos_emb = 0.02 * jax.random.normal(k_pos, (1, max_len, num_hiddens), jnp.float32)

    block_keys = jax.random.split(k_blocks, num_layers)
    block_params = [init_block_params(bk, num_steps, num_hiddens, ffn_num_hiddens)
                    for bk in block_keys]

    tokens = jax.random.randint(k_ids, (batch_size, num_steps), 0, vocab_size, jnp.int32)
    segments = jnp.concatenate(
        [jnp.zeros((batch_size, num_steps // 2), jnp.int32),
         jnp.ones((batch_size, num_steps - num_steps // 2), jnp.int32)], axis=1)
    valid_lens = jnp.array([5, 3], dtype=jnp.int32)

    out = bert_encoder(tokens, segments, valid_lens,
                       token_emb, segment_emb, pos_emb, block_params, num_heads)
    out = jax.block_until_ready(out)
    assert out.shape == (batch_size, num_steps, num_hiddens)
    assert bool(jnp.all(jnp.isfinite(out)))
    print("KERNEL_OK")
</pallas_src>

<mosaic_0001>
module attributes {stable_mosaic.version = 11 : i64} {
  func.func @_bert_stack_kernel(%arg0: i32, %arg1: memref<16x128xf32, #tpu.memory_space<vmem>>, %arg2: memref<8x1x1xi32, #tpu.memory_space<vmem>>, %arg3: memref<1x128x384xbf16, #tpu.memory_space<vmem>>, %arg4: memref<1x1x384xf32, #tpu.memory_space<vmem>>, %arg5: memref<1x128x128xbf16, #tpu.memory_space<vmem>>, %arg6: memref<1x1x128xf32, #tpu.memory_space<vmem>>, %arg7: memref<1x128x256xbf16, #tpu.memory_space<vmem>>, %arg8: memref<1x1x256xf32, #tpu.memory_space<vmem>>, %arg9: memref<1x256x128xbf16, #tpu.memory_space<vmem>>, %arg10: memref<1x1x128xf32, #tpu.memory_space<vmem>>, %arg11: memref<1x8x128xf32, #tpu.memory_space<vmem>>, %arg12: memref<1x8x128xf32, #tpu.memory_space<vmem>>, %arg13: memref<1x8x128xf32, #tpu.memory_space<vmem>>, %arg14: memref<1x8x128xf32, #tpu.memory_space<vmem>>, %arg15: memref<2x8x128xf32, #tpu.memory_space<vmem>>, %arg16: memref<16x128xbf16, #tpu.memory_space<vmem>>) attributes {dimension_semantics = [#tpu.dimension_semantics<arbitrary>], iteration_bounds = array<i64: 2>, scalar_prefetch = 0 : i64, scratch_operands = 1 : i64, tpu.core_type = #tpu.core_type<tc>, window_params = [{pipeline_mode = #tpu.pipeline_mode<synchronous>, transform_indices = @transform_0, window_bounds = array<i64: 16, 128>}, {pipeline_mode = #tpu.pipeline_mode<synchronous>, transform_indices = @transform_1, window_bounds = array<i64: 8, 1, 1>}, {transform_indices = @transform_2, window_bounds = array<i64: 1, 128, 384>}, {transform_indices = @transform_3, window_bounds = array<i64: 1, 1, 384>}, {transform_indices = @transform_4, window_bounds = array<i64: 1, 128, 128>}, {transform_indices = @transform_5, window_bounds = array<i64: 1, 1, 128>}, {transform_indices = @transform_6, window_bounds = array<i64: 1, 128, 256>}, {transform_indices = @transform_7, window_bounds = array<i64: 1, 1, 256>}, {transform_indices = @transform_8, window_bounds = array<i64: 1, 256, 128>}, {transform_indices = @transform_9, window_bounds = array<i64: 1, 1, 128>}, {transform_indices = @transform_10, window_bounds = array<i64: 1, 8, 128>}, {transform_indices = @transform_11, window_bounds = array<i64: 1, 8, 128>}, {transform_indices = @transform_12, window_bounds = array<i64: 1, 8, 128>}, {transform_indices = @transform_13, window_bounds = array<i64: 1, 8, 128>}, {pipeline_mode = #tpu.pipeline_mode<synchronous>, transform_indices = @transform_14, window_bounds = array<i64: 2, 8, 128>}]} {
    %c0_i32 = arith.constant 0 : i32
    %0 = arith.cmpi eq, %arg0, %c0_i32 : i32
    %1 = arith.extui %0 : i1 to i32
    %c0_i32_0 = arith.constant 0 : i32
    %2 = arith.cmpi ne, %1, %c0_i32_0 : i32
    scf.if %2 {
      %c0_68 = arith.constant 0 : index
      %c0_69 = arith.constant 0 : index
      %174 = vector.load %arg1[%c0_68, %c0_69] : memref<16x128xf32, #tpu.memory_space<vmem>>, vector<16x128xf32>
      %175 = arith.truncf %174 : vector<16x128xf32> to vector<16x128xbf16>
      %c0_70 = arith.constant 0 : index
      %c0_71 = arith.constant 0 : index
      %176 = vector.load %arg16[%c0_70, %c0_71] : memref<16x128xbf16, #tpu.memory_space<vmem>>, vector<16x128xbf16>
      tpu.vector_store %arg16[%c0_70, %c0_71], %175 {strides = array<i32>} : memref<16x128xbf16, #tpu.memory_space<vmem>>, vector<16x128xbf16>,
    } else {
    }
    %c0 = arith.constant 0 : index
    %c0_1 = arith.constant 0 : index
    %3 = vector.load %arg16[%c0, %c0_1] : memref<16x128xbf16, #tpu.memory_space<vmem>>, vector<16x128xbf16>
    %4 = arith.extf %3 : vector<16x128xbf16> to vector<16x128xf32>
    %c0_2 = arith.constant 0 : index
    %c0_3 = arith.constant 0 : index
    %c0_4 = arith.constant 0 : index
    %5 = vector.load %arg3[%c0_2, %c0_3, %c0_4] : memref<1x128x384xbf16, #tpu.memory_space<vmem>>, vector<1x128x384xbf16>
    %6 = vector.shape_cast %5 : vector<1x128x384xbf16> to vector<128x384xbf16>
    %cst = arith.constant dense<0.000000e+00> : vector<16x384xf32>
    %7 = tpu.matmul %3, %6, %cst {dimension_numbers = #tpu.dot_dimension_numbers<[1], [0], [0], [1], [0, 0, 1, 1], [], []>} : vector<16x128xbf16>, vector<128x384xbf16>, vector<16x384xf32> -> vector<16x384xf32>
    %c0_5 = arith.constant 0 : index
    %c0_6 = arith.constant 0 : index
    %c0_7 = arith.constant 0 : index
    %8 = vector.load %arg4[%c0_5, %c0_6, %c0_7] : memref<1x1x384xf32, #tpu.memory_space<vmem>>, vector<1x1x384xf32>
    %9 = vector.shape_cast %8 : vector<1x1x384xf32> to vector<1x384xf32>
    %10 = vector.broadcast %9 : vector<1x384xf32> to vector<16x384xf32>
    %11 = arith.addf %7, %10 : vector<16x384xf32>
    %12 = arith.truncf %11 : vector<16x384xf32> to vector<16x384xbf16>
    %13 = vector.extract_strided_slice %12 {offsets = [0, 0], sizes = [16, 128], strides = [1, 1]} : vector<16x384xbf16> to vector<16x128xbf16>
    %14 = vector.extract_strided_slice %13 {offsets = [0, 0], sizes = [16, 32], strides = [1, 1]} : vector<16x128xbf16> to vector<16x32xbf16>
    %15 = vector.extract_strided_slice %13 {offsets = [0, 32], sizes = [16, 32], strides = [1, 1]} : vector<16x128xbf16> to vector<16x32xbf16>
    %16 = vector.extract_strided_slice %13 {offsets = [0, 64], sizes = [16, 32], strides = [1, 1]} : vector<16x128xbf16> to vector<16x32xbf16>
    %17 = vector.extract_strided_slice %13 {offsets = [0, 96], sizes = [16, 32], strides = [1, 1]} : vector<16x128xbf16> to vector<16x32xbf16>
    %18 = vector.shape_cast %14 : vector<16x32xbf16> to vector<1x16x32xbf16>
    %19 = vector.shape_cast %15 : vector<16x32xbf16> to vector<1x16x32xbf16>
    %20 = vector.shape_cast %16 : vector<16x32xbf16> to vector<1x16x32xbf16>
    %21 = vector.shape_cast %17 : vector<16x32xbf16> to vector<1x16x32xbf16>
    %22 = tpu.concatenate %18, %19, %20, %21 in 0 : vector<1x16x32xbf16>, vector<1x16x32xbf16>, vector<1x16x32xbf16>, vector<1x16x32xbf16> -> vector<4x16x32xbf16>
    %23 = vector.shape_cast %22 : vector<4x16x32xbf16> to vector<8x8x32xbf16>
    %24 = vector.extract_strided_slice %12 {offsets = [0, 128], sizes = [16, 128], strides = [1, 1]} : vector<16x384xbf16> to vector<16x128xbf16>
    %25 = vector.extract_strided_slice %24 {offsets = [0, 0], sizes = [16, 32], strides = [1, 1]} : vector<16x128xbf16> to vector<16x32xbf16>
    %26 = vector.extract_strided_slice %24 {offsets = [0, 32], sizes = [16, 32], strides = [1, 1]} : vector<16x128xbf16> to vector<16x32xbf16>
    %27 = vector.extract_strided_slice %24 {offsets = [0, 64], sizes = [16, 32], strides = [1, 1]} : vector<16x128xbf16> to vector<16x32xbf16>
    %28 = vector.extract_strided_slice %24 {offsets = [0, 96], sizes = [16, 32], strides = [1, 1]} : vector<16x128xbf16> to vector<16x32xbf16>
    %29 = vector.shape_cast %25 : vector<16x32xbf16> to vector<1x16x32xbf16>
    %30 = vector.shape_cast %26 : vector<16x32xbf16> to vector<1x16x32xbf16>
    %31 = vector.shape_cast %27 : vector<16x32xbf16> to vector<1x16x32xbf16>
    %32 = vector.shape_cast %28 : vector<16x32xbf16> to vector<1x16x32xbf16>
    %33 = tpu.concatenate %29, %30, %31, %32 in 0 : vector<1x16x32xbf16>, vector<1x16x32xbf16>, vector<1x16x32xbf16>, vector<1x16x32xbf16> -> vector<4x16x32xbf16>
    %34 = vector.shape_cast %33 : vector<4x16x32xbf16> to vector<8x8x32xbf16>
    %35 = vector.extract_strided_slice %12 {offsets = [0, 256], sizes = [16, 128], strides = [1, 1]} : vector<16x384xbf16> to vector<16x128xbf16>
    %36 = vector.extract_strided_slice %35 {offsets = [0, 0], sizes = [16, 32], strides = [1, 1]} : vector<16x128xbf16> to vector<16x32xbf16>
    %37 = vector.extract_strided_slice %35 {offsets = [0, 32], sizes = [16, 32], strides = [1, 1]} : vector<16x128xbf16> to vector<16x32xbf16>
    %38 = vector.extract_strided_slice %35 {offsets = [0, 64], sizes = [16, 32], strides = [1, 1]} : vector<16x128xbf16> to vector<16x32xbf16>
    %39 = vector.extract_strided_slice %35 {offsets = [0, 96], sizes = [16, 32], strides = [1, 1]} : vector<16x128xbf16> to vector<16x32xbf16>
    %40 = vector.shape_cast %36 : vector<16x32xbf16> to vector<1x16x32xbf16>
    %41 = vector.shape_cast %37 : vector<16x32xbf16> to vector<1x16x32xbf16>
    %42 = vector.shape_cast %38 : vector<16x32xbf16> to vector<1x16x32xbf16>
    %43 = vector.shape_cast %39 : vector<16x32xbf16> to vector<1x16x32xbf16>
    %44 = tpu.concatenate %40, %41, %42, %43 in 0 : vector<1x16x32xbf16>, vector<1x16x32xbf16>, vector<1x16x32xbf16>, vector<1x16x32xbf16> -> vector<4x16x32xbf16>
    %45 = vector.shape_cast %44 : vector<4x16x32xbf16> to vector<8x8x32xbf16>
    "tpu.trace_start"() <{level = 10 : i32, message = "bqd,bkd->bqk"}> : () -> ()
    %cst_8 = arith.constant dense<0.000000e+00> : vector<8x8x8xf32>
    %46 = tpu.matmul %23, %34, %cst_8 {dimension_numbers = #tpu.dot_dimension_numbers<[2], [2], [1], [1], [0, 0, 0, 1, 1, 1], [0], [0]>} : vector<8x8x32xbf16>, vector<8x8x32xbf16>, vector<8x8x8xf32> -> vector<8x8x8xf32>
    "tpu.trace_stop"() : () -> ()
    %cst_9 = arith.constant 0.176776692 : f32
    %47 = vector.broadcast %cst_9 : f32 to vector<8x8x8xf32>
    %48 = arith.mulf %46, %47 : vector<8x8x8xf32>
    %49 = tpu.iota {dimensions = array<i32: 2>} : vector<8x8x8xi32>
    %c0_10 = arith.constant 0 : index
    %c0_11 = arith.constant 0 : index
    %c0_12 = arith.constant 0 : index
    %50 = vector.load %arg2[%c0_10, %c0_11, %c0_12] : memref<8x1x1xi32, #tpu.memory_space<vmem>>, vector<8x1x1xi32>
    %51 = vector.broadcast %50 : vector<8x1x1xi32> to vector<8x8x8xi32>
    %52 = arith.cmpi slt, %49, %51 : vector<8x8x8xi32>
    %cst_13 = arith.constant -1.000000e+06 : f32
    %53 = vector.broadcast %cst_13 : f32 to vector<8x8x8xf32>
    %54 = arith.select %52, %48, %53 : vector<8x8x8xi1>, vector<8x8x8xf32>
    %cst_14 = arith.constant dense<0xFF800000> : vector<8x8xf32>
    %55 = vector.multi_reduction <maximumf>, %54, %cst_14 [2] : vector<8x8x8xf32> to vector<8x8xf32>
    %56 = vector.shape_cast %55 : vector<8x8xf32> to vector<8x8x1xf32>
    %57 = vector.broadcast %56 : vector<8x8x1xf32> to vector<8x8x8xf32>
    %58 = arith.subf %54, %57 : vector<8x8x8xf32>
    %59 = math.exp %58 : vector<8x8x8xf32>
    %cst_15 = arith.constant dense<0.000000e+00> : vector<8x8xf32>
    %60 = vector.multi_reduction <add>, %59, %cst_15 [2] : vector<8x8x8xf32> to vector<8x8xf32>
    %61 = vector.shape_cast %60 : vector<8x8xf32> to vector<8x8x1xf32>
    %62 = tpu.reciprocal %61 {approx = true} : vector<8x8x1xf32> -> vector<8x8x1xf32>
    %63 = vector.broadcast %62 : vector<8x8x1xf32> to vector<8x8x8xf32>
    %64 = arith.mulf %59, %63 : vector<8x8x8xf32>
    %65 = arith.truncf %64 : vector<8x8x8xf32> to vector<8x8x8xbf16>
    "tpu.trace_start"() <{level = 10 : i32, message = "bqk,bkd->bqd"}> : () -> ()
    %cst_16 = arith.constant dense<0.000000e+00> : vector<8x8x32xf32>
    %66 = tpu.matmul %65, %45, %cst_16 {dimension_numbers = #tpu.dot_dimension_numbers<[2], [1], [1], [2], [0, 0, 0, 1, 1, 2], [0], [0]>} : vector<8x8x8xbf16>, vector<8x8x32xbf16>, vector<8x8x32xf32> -> vector<8x8x32xf32>
    "tpu.trace_stop"() : () -> ()
    %67 = vector.shape_cast %66 : vector<8x8x32xf32> to vector<4x16x32xf32>
    %68 = vector.extract_strided_slice %67 {offsets = [0, 0, 0], sizes = [1, 16, 32], strides = [1, 1, 1]} : vector<4x16x32xf32> to vector<1x16x32xf32>
    %69 = vector.shape_cast %68 : vector<1x16x32xf32> to vector<16x32xf32>
    %70 = vector.extract_strided_slice %67 {offsets = [1, 0, 0], sizes = [1, 16, 32], strides = [1, 1, 1]} : vector<4x16x32xf32> to vector<1x16x32xf32>
    %71 = vector.shape_cast %70 : vector<1x16x32xf32> to vector<16x32xf32>
    %72 = vector.extract_strided_slice %67 {offsets = [2, 0, 0], sizes = [1, 16, 32], strides = [1, 1, 1]} : vector<4x16x32xf32> to vector<1x16x32xf32>
    %73 = vector.shape_cast %72 : vector<1x16x32xf32> to vector<16x32xf32>
    %74 = vector.extract_strided_slice %67 {offsets = [3, 0, 0], sizes = [1, 16, 32], strides = [1, 1, 1]} : vector<4x16x32xf32> to vector<1x16x32xf32>
    %75 = vector.shape_cast %74 : vector<1x16x32xf32> to vector<16x32xf32>
    %76 = tpu.concatenate %69, %71, %73, %75 in 1 : vector<16x32xf32>, vector<16x32xf32>, vector<16x32xf32>, vector<16x32xf32> -> vector<16x128xf32>
    %77 = arith.truncf %76 : vector<16x128xf32> to vector<16x128xbf16>
    %c0_17 = arith.constant 0 : index
    %c0_18 = arith.constant 0 : index
    %c0_19 = arith.constant 0 : index
    %78 = vector.load %arg5[%c0_17, %c0_18, %c0_19] : memref<1x128x128xbf16, #tpu.memory_space<vmem>>, vector<1x128x128xbf16>
    %79 = vector.shape_cast %78 : vector<1x128x128xbf16> to vector<128x128xbf16>
    %cst_20 = arith.constant dense<0.000000e+00> : vector<16x128xf32>
    %80 = tpu.matmul %77, %79, %cst_20 {dimension_numbers = #tpu.dot_dimension_numbers<[1], [0], [0], [1], [0, 0, 1, 1], [], []>} : vector<16x128xbf16>, vector<128x128xbf16>, vector<16x128xf32> -> vector<16x128xf32>
    %c0_21 = arith.constant 0 : index
    %c0_22 = arith.constant 0 : index
    %c0_23 = arith.constant 0 : index
    %81 = vector.load %arg6[%c0_21, %c0_22, %c0_23] : memref<1x1x128xf32, #tpu.memory_space<vmem>>, vector<1x1x128xf32>
    %82 = vector.shape_cast %81 : vector<1x1x128xf32> to vector<1x128xf32>
    %83 = vector.broadcast %82 : vector<1x128xf32> to vector<16x128xf32>
    %84 = arith.addf %80, %83 : vector<16x128xf32>
    %85 = arith.addf %4, %84 : vector<16x128xf32>
    %86 = vector.shape_cast %85 : vector<16x128xf32> to vector<2x8x128xf32>
    %cst_24 = arith.constant dense<0.000000e+00> : vector<2x8xf32>
    %87 = vector.multi_reduction <add>, %86, %cst_24 [2] : vector<2x8x128xf32> to vector<2x8xf32>
    %88 = vector.shape_cast %87 : vector<2x8xf32> to vector<2x8x1xf32>
    %cst_25 = arith.constant dense<0.000000e+00> : vector<2x1xf32>
    %89 = vector.multi_reduction <add>, %88, %cst_25 [1] : vector<2x8x1xf32> to vector<2x1xf32>
    %90 = vector.shape_cast %89 : vector<2x1xf32> to vector<2x1x1xf32>
    %cst_26 = arith.constant 1.024000e+03 : f32
    %91 = vector.broadcast %cst_26 : f32 to vector<2x1x1xf32>
    %92 = arith.divf %90, %91 : vector<2x1x1xf32>
    %93 = vector.broadcast %92 : vector<2x1x1xf32> to vector<2x8x128xf32>
    %94 = arith.subf %86, %93 : vector<2x8x128xf32>
    %95 = arith.mulf %94, %94 : vector<2x8x128xf32>
    %cst_27 = arith.constant dense<0.000000e+00> : vector<2x8xf32>
    %96 = vector.multi_reduction <add>, %95, %cst_27 [2] : vector<2x8x128xf32> to vector<2x8xf32>
    %97 = vector.shape_cast %96 : vector<2x8xf32> to vector<2x8x1xf32>
    %cst_28 = arith.constant dense<0.000000e+00> : vector<2x1xf32>
    %98 = vector.multi_reduction <add>, %97, %cst_28 [1] : vector<2x8x1xf32> to vector<2x1xf32>
    %99 = vector.shape_cast %98 : vector<2x1xf32> to vector<2x1x1xf32>
    %cst_29 = arith.constant 1.024000e+03 : f32
    %100 = vector.broadcast %cst_29 : f32 to vector<2x1x1xf32>
    %101 = arith.divf %99, %100 : vector<2x1x1xf32>
    %cst_30 = arith.constant 9.99999974E-6 : f32
    %102 = vector.broadcast %cst_30 : f32 to vector<2x1x1xf32>
    %103 = arith.addf %101, %102 : vector<2x1x1xf32>
    %104 = math.rsqrt %103 : vector<2x1x1xf32>
    %105 = vector.broadcast %104 : vector<2x1x1xf32> to vector<2x8x128xf32>
    %106 = arith.mulf %94, %105 : vector<2x8x128xf32>
    %c0_31 = arith.constant 0 : index
    %c0_32 = arith.constant 0 : index
    %c0_33 = arith.constant 0 : index
    %107 = vector.load %arg11[%c0_31, %c0_32, %c0_33] : memref<1x8x128xf32, #tpu.memory_space<vmem>>, vector<1x8x128xf32>
    %108 = vector.shape_cast %107 : vector<1x8x128xf32> to vector<8x128xf32>
    %109 = vector.shape_cast %108 : vector<8x128xf32> to vector<1x8x128xf32>
    %110 = vector.broadcast %109 : vector<1x8x128xf32> to vector<2x8x128xf32>
    %111 = arith.mulf %106, %110 : vector<2x8x128xf32>
    %c0_34 = arith.constant 0 : index
    %c0_35 = arith.constant 0 : index
    %c0_36 = arith.constant 0 : index
    %112 = vector.load %arg12[%c0_34, %c0_35, %c0_36] : memref<1x8x128xf32, #tpu.memory_space<vmem>>, vector<1x8x128xf32>
    %113 = vector.shape_cast %112 : vector<1x8x128xf32> to vector<8x128xf32>
    %114 = vector.shape_cast %113 : vector<8x128xf32> to vector<1x8x128xf32>
    %115 = vector.broadcast %114 : vector<1x8x128xf32> to vector<2x8x128xf32>
    %116 = arith.addf %111, %115 : vector<2x8x128xf32>
    %117 = vector.shape_cast %116 : vector<2x8x128xf32> to vector<16x128xf32>
    %118 = arith.truncf %117 : vector<16x128xf32> to vector<16x128xbf16>
    %c0_37 = arith.constant 0 : index
    %c0_38 = arith.constant 0 : index
    %c0_39 = arith.constant 0 : index
    %119 = vector.load %arg7[%c0_37, %c0_38, %c0_39] : memref<1x128x256xbf16, #tpu.memory_space<vmem>>, vector<1x128x256xbf16>
    %120 = vector.shape_cast %119 : vector<1x128x256xbf16> to vector<128x256xbf16>
    %cst_40 = arith.constant dense<0.000000e+00> : vector<16x256xf32>
    %121 = tpu.matmul %118, %120, %cst_40 {dimension_numbers = #tpu.dot_dimension_numbers<[1], [0], [0], [1], [0, 0, 1, 1], [], []>} : vector<16x128xbf16>, vector<128x256xbf16>, vector<16x256xf32> -> vector<16x256xf32>
    %c0_41 = arith.constant 0 : index
    %c0_42 = arith.constant 0 : index
    %c0_43 = arith.constant 0 : index
    %122 = vector.load %arg8[%c0_41, %c0_42, %c0_43] : memref<1x1x256xf32, #tpu.memory_space<vmem>>, vector<1x1x256xf32>
    %123 = vector.shape_cast %122 : vector<1x1x256xf32> to vector<1x256xf32>
    %124 = vector.broadcast %123 : vector<1x256xf32> to vector<16x256xf32>
    %125 = arith.addf %121, %124 : vector<16x256xf32>
    %cst_44 = arith.constant 0.000000e+00 : f32
    %126 = vector.broadcast %cst_44 : f32 to vector<16x256xf32>
    %127 = arith.maximumf %125, %126 : vector<16x256xf32>
    %128 = arith.truncf %127 : vector<16x256xf32> to vector<16x256xbf16>
    %c0_45 = arith.constant 0 : index
    %c0_46 = arith.constant 0 : index
    %c0_47 = arith.constant 0 : index
    %129 = vector.load %arg9[%c0_45, %c0_46, %c0_47] : memref<1x256x128xbf16, #tpu.memory_space<vmem>>, vector<1x256x128xbf16>
    %130 = vector.shape_cast %129 : vector<1x256x128xbf16> to vector<256x128xbf16>
    %cst_48 = arith.constant dense<0.000000e+00> : vector<16x128xf32>
    %131 = tpu.matmul %128, %130, %cst_48 {dimension_numbers = #tpu.dot_dimension_numbers<[1], [0], [0], [1], [0, 0, 1, 1], [], []>} : vector<16x256xbf16>, vector<256x128xbf16>, vector<16x128xf32> -> vector<16x128xf32>
    %c0_49 = arith.constant 0 : index
    %c0_50 = arith.constant 0 : index
    %c0_51 = arith.constant 0 : index
    %132 = vector.load %arg10[%c0_49, %c0_50, %c0_51] : memref<1x1x128xf32, #tpu.memory_space<vmem>>, vector<1x1x128xf32>
    %133 = vector.shape_cast %132 : vector<1x1x128xf32> to vector<1x128xf32>
    %134 = vector.broadcast %133 : vector<1x128xf32> to vector<16x128xf32>
    %135 = arith.addf %131, %134 : vector<16x128xf32>
    %136 = arith.addf %117, %135 : vector<16x128xf32>
    %137 = vector.shape_cast %136 : vector<16x128xf32> to vector<2x8x128xf32>
    %cst_52 = arith.constant dense<0.000000e+00> : vector<2x8xf32>
    %138 = vector.multi_reduction <add>, %137, %cst_52 [2] : vector<2x8x128xf32> to vector<2x8xf32>
    %139 = vector.shape_cast %138 : vector<2x8xf32> to vector<2x8x1xf32>
    %cst_53 = arith.constant dense<0.000000e+00> : vector<2x1xf32>
    %140 = vector.multi_reduction <add>, %139, %cst_53 [1] : vector<2x8x1xf32> to vector<2x1xf32>
    %141 = vector.shape_cast %140 : vector<2x1xf32> to vector<2x1x1xf32>
    %cst_54 = arith.constant 1.024000e+03 : f32
    %142 = vector.broadcast %cst_54 : f32 to vector<2x1x1xf32>
    %143 = arith.divf %141, %142 : vector<2x1x1xf32>
    %144 = vector.broadcast %143 : vector<2x1x1xf32> to vector<2x8x128xf32>
    %145 = arith.subf %137, %144 : vector<2x8x128xf32>
    %146 = arith.mulf %145, %145 : vector<2x8x128xf32>
    %cst_55 = arith.constant dense<0.000000e+00> : vector<2x8xf32>
    %147 = vector.multi_reduction <add>, %146, %cst_55 [2] : vector<2x8x128xf32> to vector<2x8xf32>
    %148 = vector.shape_cast %147 : vector<2x8xf32> to vector<2x8x1xf32>
    %cst_56 = arith.constant dense<0.000000e+00> : vector<2x1xf32>
    %149 = vector.multi_reduction <add>, %148, %cst_56 [1] : vector<2x8x1xf32> to vector<2x1xf32>
    %150 = vector.shape_cast %149 : vector<2x1xf32> to vector<2x1x1xf32>
    %cst_57 = arith.constant 1.024000e+03 : f32
    %151 = vector.broadcast %cst_57 : f32 to vector<2x1x1xf32>
    %152 = arith.divf %150, %151 : vector<2x1x1xf32>
    %cst_58 = arith.constant 9.99999974E-6 : f32
    %153 = vector.broadcast %cst_58 : f32 to vector<2x1x1xf32>
    %154 = arith.addf %152, %153 : vector<2x1x1xf32>
    %155 = math.rsqrt %154 : vector<2x1x1xf32>
    %156 = vector.broadcast %155 : vector<2x1x1xf32> to vector<2x8x128xf32>
    %157 = arith.mulf %145, %156 : vector<2x8x128xf32>
    %c0_59 = arith.constant 0 : index
    %c0_60 = arith.constant 0 : index
    %c0_61 = arith.constant 0 : index
    %158 = vector.load %arg13[%c0_59, %c0_60, %c0_61] : memref<1x8x128xf32, #tpu.memory_space<vmem>>, vector<1x8x128xf32>
    %159 = vector.shape_cast %158 : vector<1x8x128xf32> to vector<8x128xf32>
    %160 = vector.shape_cast %159 : vector<8x128xf32> to vector<1x8x128xf32>
    %161 = vector.broadcast %160 : vector<1x8x128xf32> to vector<2x8x128xf32>
    %162 = arith.mulf %157, %161 : vector<2x8x128xf32>
    %c0_62 = arith.constant 0 : index
    %c0_63 = arith.constant 0 : index
    %c0_64 = arith.constant 0 : index
    %163 = vector.load %arg14[%c0_62, %c0_63, %c0_64] : memref<1x8x128xf32, #tpu.memory_space<vmem>>, vector<1x8x128xf32>
    %164 = vector.shape_cast %163 : vector<1x8x128xf32> to vector<8x128xf32>
    %165 = vector.shape_cast %164 : vector<8x128xf32> to vector<1x8x128xf32>
    %166 = vector.broadcast %165 : vector<1x8x128xf32> to vector<2x8x128xf32>
    %167 = arith.addf %162, %166 : vector<2x8x128xf32>
    %168 = vector.shape_cast %167 : vector<2x8x128xf32> to vector<16x128xf32>
    %169 = arith.truncf %168 : vector<16x128xf32> to vector<16x128xbf16>
    %c0_65 = arith.constant 0 : index
    %c0_66 = arith.constant 0 : index
    %170 = vector.load %arg16[%c0_65, %c0_66] : memref<16x128xbf16, #tpu.memory_space<vmem>>, vector<16x128xbf16>
    tpu.vector_store %arg16[%c0_65, %c0_66], %169 {strides = array<i32>} : memref<16x128xbf16, #tpu.memory_space<vmem>>, vector<16x128xbf16>,
    %c1_i32 = arith.constant 1 : i32
    %171 = arith.cmpi eq, %arg0, %c1_i32 : i32
    %172 = arith.extui %171 : i1 to i32
    %c0_i32_67 = arith.constant 0 : i32
    %173 = arith.cmpi ne, %172, %c0_i32_67 : i32
    scf.if %173 {
      %174 = vector.shape_cast %168 : vector<16x128xf32> to vector<2x8x128xf32>
      %c0_68 = arith.constant 0 : index
      %c0_69 = arith.constant 0 : index
      %c0_70 = arith.constant 0 : index
      %175 = vector.load %arg15[%c0_68, %c0_69, %c0_70] : memref<2x8x128xf32, #tpu.memory_space<vmem>>, vector<2x8x128xf32>
      tpu.vector_store %arg15[%c0_68, %c0_69, %c0_70], %174 {strides = array<i32>} : memref<2x8x128xf32, #tpu.memory_space<vmem>>, vector<2x8x128xf32>,
    } else {
    }
    return
  }
  func.func @transform_0(%arg0: i32) -> (i32, i32) {
    %c0_i32 = arith.constant 0 : i32
    %c0_i32_0 = arith.constant 0 : i32
    %c0_i32_1 = arith.constant 0 : i32
    return %c0_i32, %c0_i32_0 : i32, i32
  }
  func.func @transform_1(%arg0: i32) -> (i32, i32, i32) {
    %c0_i32 = arith.constant 0 : i32
    %c0_i32_0 = arith.constant 0 : i32
    %c0_i32_1 = arith.constant 0 : i32
    %c0_i32_2 = arith.constant 0 : i32
    return %c0_i32, %c0_i32_0, %c0_i32_1 : i32, i32, i32
  }
  func.func @transform_2(%arg0: i32) -> (i32, i32, i32) {
    %c0_i32 = arith.constant 0 : i32
    %c0_i32_0 = arith.constant 0 : i32
    %c0_i32_1 = arith.constant 0 : i32
    return %arg0, %c0_i32, %c0_i32_0 : i32, i32, i32
  }
  func.func @transform_3(%arg0: i32) -> (i32, i32, i32) {
    %c0_i32 = arith.constant 0 : i32
    %c0_i32_0 = arith.constant 0 : i32
    %c0_i32_1 = arith.constant 0 : i32
    return %arg0, %c0_i32, %c0_i32_0 : i32, i32, i32
  }
  func.func @transform_4(%arg0: i32) -> (i32, i32, i32) {
    %c0_i32 = arith.constant 0 : i32
    %c0_i32_0 = arith.constant 0 : i32
    %c0_i32_1 = arith.constant 0 : i32
    return %arg0, %c0_i32, %c0_i32_0 : i32, i32, i32
  }
  func.func @transform_5(%arg0: i32) -> (i32, i32, i32) {
    %c0_i32 = arith.constant 0 : i32
    %c0_i32_0 = arith.constant 0 : i32
    %c0_i32_1 = arith.constant 0 : i32
    return %arg0, %c0_i32, %c0_i32_0 : i32, i32, i32
  }
  func.func @transform_6(%arg0: i32) -> (i32, i32, i32) {
    %c0_i32 = arith.constant 0 : i32
    %c0_i32_0 = arith.constant 0 : i32
    %c0_i32_1 = arith.constant 0 : i32
    return %arg0, %c0_i32, %c0_i32_0 : i32, i32, i32
  }
  func.func @transform_7(%arg0: i32) -> (i32, i32, i32) {
    %c0_i32 = arith.constant 0 : i32
    %c0_i32_0 = arith.constant 0 : i32
    %c0_i32_1 = arith.constant 0 : i32
    return %arg0, %c0_i32, %c0_i32_0 : i32, i32, i32
  }
  func.func @transform_8(%arg0: i32) -> (i32, i32, i32) {
    %c0_i32 = arith.constant 0 : i32
    %c0_i32_0 = arith.constant 0 : i32
    %c0_i32_1 = arith.constant 0 : i32
    return %arg0, %c0_i32, %c0_i32_0 : i32, i32, i32
  }
  func.func @transform_9(%arg0: i32) -> (i32, i32, i32) {
    %c0_i32 = arith.constant 0 : i32
    %c0_i32_0 = arith.constant 0 : i32
    %c0_i32_1 = arith.constant 0 : i32
    return %arg0, %c0_i32, %c0_i32_0 : i32, i32, i32
  }
  func.func @transform_10(%arg0: i32) -> (i32, i32, i32) {
    %c0_i32 = arith.constant 0 : i32
    %c0_i32_0 = arith.constant 0 : i32
    %c0_i32_1 = arith.constant 0 : i32
    return %arg0, %c0_i32, %c0_i32_0 : i32, i32, i32
  }
  func.func @transform_11(%arg0: i32) -> (i32, i32, i32) {
    %c0_i32 = arith.constant 0 : i32
    %c0_i32_0 = arith.constant 0 : i32
    %c0_i32_1 = arith.constant 0 : i32
    return %arg0, %c0_i32, %c0_i32_0 : i32, i32, i32
  }
  func.func @transform_12(%arg0: i32) -> (i32, i32, i32) {
    %c0_i32 = arith.constant 0 : i32
    %c0_i32_0 = arith.constant 0 : i32
    %c0_i32_1 = arith.constant 0 : i32
    return %arg0, %c0_i32, %c0_i32_0 : i32, i32, i32
  }
  func.func @transform_13(%arg0: i32) -> (i32, i32, i32) {
    %c0_i32 = arith.constant 0 : i32
    %c0_i32_0 = arith.constant 0 : i32
    %c0_i32_1 = arith.constant 0 : i32
    return %arg0, %c0_i32, %c0_i32_0 : i32, i32, i32
  }
  func.func @transform_14(%arg0: i32) -> (i32, i32, i32) {
    %c0_i32 = arith.constant 0 : i32
    %c0_i32_0 = arith.constant 0 : i32
    %c0_i32_1 = arith.constant 0 : i32
    %c0_i32_2 = arith.constant 0 : i32
    return %c0_i32, %c0_i32_0, %c0_i32_1 : i32, i32, i32
  }
}

</mosaic_0001>

<bundles_post_ra>
// kernel: tpu_custom_call.1
= control target key start
LH: loop header
LB: loop body
LE: loop exit
PB: predicated region body
PF: predicated region fallthrough
CT: control target
= control target key end

     0   :  { %s4792_s0 = inlined_call_operand.hbm [shape: f32[16,128], index: 0, kind: input, shape index: {}]   ;;  %s4793_s1 = inlined_call_operand.vmem [shape: s32[8,1,1], index: 1, kind: input, shape index: {}]   ;;  %s4794_s2 = inlined_call_operand.hbm [shape: bf16[2,128,384], index: 2, kind: input, shape index: {}]   ;;  %s4795_s3 = inlined_call_operand.hbm [shape: f32[2,1,384], index: 3, kind: input, shape index: {}]   ;;  %s4796_s4 = inlined_call_operand.hbm [shape: bf16[2,128,128], index: 4, kind: input, shape index: {}]   ;;  %s4797_s5 = inlined_call_operand.vmem [shape: f32[2,1,128], index: 5, kind: input, shape index: {}]   ;;  %s4798_s6 = inlined_call_operand.hbm [shape: bf16[2,128,256], index: 6, kind: input, shape index: {}]   ;;  %s4799_s7 = inlined_call_operand.hbm [shape: f32[2,1,256], index: 7, kind: input, shape index: {}]   ;;  %s4800_s8 = inlined_call_operand.hbm [shape: bf16[2,256,128], index: 8, kind: input, shape index: {}]   ;;  %s4801_s9 = inlined_call_operand.hbm [shape: f32[2,1,128], index: 9, kind: input, shape index: {}]   ;;  %s4802_s10 = inlined_call_operand.vmem [shape: f32[2,8,128], index: 10, kind: input, shape index: {}]   ;;  %s4803_s11 = inlined_call_operand.vmem [shape: f32[2,8,128], index: 11, kind: input, shape index: {}]   ;;  %s4804_s12 = inlined_call_operand.vmem [shape: f32[2,8,128], index: 12, kind: input, shape index: {}]   ;;  %s4805_s13 = inlined_call_operand.hbm [shape: f32[2,8,128], index: 13, kind: input, shape index: {}]   ;;  %s4806_s14 = inlined_call_operand.hbm [shape: f32[2,8,128], index: 14, kind: output, shape index: {}]  }
   0x1   :  { %4825 = sst [smem:[#allocation28_spill]] %s4792_s0 }
   0x2   :  { %4826 = sst [smem:[#allocation29_spill]] %s4793_s1 }
   0x3   :  { %4827 = sst [smem:[#allocation30_spill]] %s4794_s2 }
   0x4   :  { %4828 = sst [smem:[#allocation31_spill]] %s4795_s3 }
   0x5   :  { %4829 = sst [smem:[#allocation32_spill]] %s4796_s4 }
   0x6   :  { %4830 = sst [smem:[#allocation33_spill]] %s4799_s7 }
   0x7   :  { %4831 = sst [smem:[#allocation34_spill]] %s4801_s9 }
   0x8   :  { %4832 = sst [smem:[#allocation35_spill]] %s4802_s10 }
   0x9   :  { %4833 = sst [smem:[#allocation36_spill]] %s4803_s11 }
   0xa   :  { %4834 = sst [smem:[#allocation37_spill]] %s4804_s12 }
   0xb   :  { %4835 = sst [smem:[#allocation38_spill]] %s4806_s14 }
   0xc   :  { %19 = vsyncpa [#allocation4], 0 }
   0xd   :  { %20 = vsyncpa [#allocation7], 0 }
   0xe   :  { %22 = vsyncpa [#allocation7 + $0x1], 0 }
   0xf   :  { %23 = vsyncpa [#allocation10], 0 }
  0x10   :  { %25 = vsyncpa [#allocation10 + $0x1], 0 }
  0x11   :  { %26 = vsyncpa [#allocation13], 0 }
  0x12   :  { %28 = vsyncpa [#allocation13 + $0x1], 0 }
  0x13   :  { %29 = vsyncpa [#allocation16], 0 }
  0x14   :  { %31 = vsyncpa [#allocation16 + $0x1], 0 }
  0x15   :  { %32 = vsyncpa [#allocation5], 0  ;;  %s4004_s29 = smov 0   ;;  %s4006_s30 = smov 0  }
  0x16   :  { %s4008_s15 = smov 0   ;;  %s4010_s16 = smov 0  }
  0x17 LB: > { %4836 = sst [smem:[#allocation25_spill]] %s3899_s15  ;;  %s4025_s17 = sadd.s32 1, %s3903_s16   ;;  %s3903_s16 = sphi %s4010_s16, %s4880_s16   ;;  %s3899_s15 = sphi %s4008_s15, %s4882_s15   ;;  %s3895_s30 = sphi %s4006_s30, %s4884_s30   ;;  %s3891_s29 = sphi %s4004_s29, %s4883_s29  }
  0x18   : > { %4837 = sst [smem:[#allocation26_spill]] %s4025_s17  ;;  %s87_s18 = sadd.s32 1, %s3899_s15 }
  0x19   : > { %s84_s19 = ssub.s32 %s3903_s16, %s4025_s17  ;;  %p94_p0 = scmp.ne.s32.totalorder %s3899_s15, %s3895_s30 }
  0x1a   : > { %p85_p1 = scmp.eq.s32.totalorder %s84_s19, 0  ;;  %p95_p2 = scmp.eq.s32.totalorder %s3903_s16, 0 }
  0x1b   : > { %p3366_p3 = scmp.lt.s32.totalorder %s3903_s16, 2  ;;  %s4038_s21 = sand.u32 1, %s3903_s16  }
  0x1c   : > { %s4035_s20 = scalar_select %p85_p1, %s3899_s15, %s87_s18  }
  0x1d   : > { %p96_p4 = por %p95_p2, %p94_p0  ;;  %s4041_s22 = sand.u32 1, %s3899_s15  }
  0x1e   : > { %4838 = sst [smem:[#allocation27_spill]] %s4035_s20  ;;  %s3306_s23 = smul.u32 192, %s4041_s22 }
  0x1f   : > { %p4044_p5 = pnand %p3366_p3, %p96_p4  ;;  %s3307_s25 = smul.u32 3072, %s3903_s16 }
  0x20   : > { %s4840_s2 = sld [smem:[#allocation30_spill]]  ;;  %s451_s18 = scalar_lea.vmem [#allocation6], %s3306_s23 }
  0x21   : > { %s4839_s24 = scalar_select %p4044_p5, 1, 0 }
  0x22   : > { %s458_s19 = sshll.u32 %s451_s18, 4  ;;  %p4061_p7 = pneg %p4044_p5  ;;  %s4054_s19 = int_to_ptr.vmem [resolvable:$true] %s458_s19 }
  0x24   : > { %s4841_s17 = scalar_select %p4061_p7, 1, 0 }
  0x26   : > { %s4052_s28 = scalar_lea.hbm %s4840_s2, %s3307_s25  ;;  %s3560_s27 = scalar_lea.hbm %s4840_s2, 6144 }
  0x27   : > { %s3555_s15 = scalar_lea.hbm %s4052_s28, 3072  ;;  %p3561_p10 = scmp.lt.u32.totalorder %s4052_s28, %s4840_s2 }
  0x28   : > { %p3556_p6 = scmp.ne.s32.totalorder %s4052_s28, %s3555_s15  ;;  %p3562_p11 = scmp.lt.u32.totalorder %s3560_s27, %s3555_s15 }
  0x29   : > { %p3564_p13 = scmp.lt.u32.totalorder %s3555_s15, %s4052_s28 }
  0x2a   : > { %p3558_p8 = pnand %p4061_p7, %p3556_p6  ;;  %p3563_p12 = por %p3562_p11, %p3561_p10 }
  0x2c   : > { %p3559_p9 = pneg %p3558_p8  ;;  %p3565_p0 = por %p3564_p13, %p3563_p12 }
  0x2e   : > { %p3566_p1 = pnand %p3565_p0, %p3559_p9 }
  0x30   : > { %3569 = shalt.err (!%p3566_p1)
}
  0x31   : > { %s3570_s20 = scalar_lea.vmem %s4054_s19, 3072  ;;  %s3905_s25 = smov [#allocation6]  }
  0x32   : > { %p3571_p2 = scmp.ne.s32.totalorder %s4054_s19, %s3570_s20  ;;  %s3575_s26 = sshll.u32 %s3905_s25, 4  ;;  %s3576_s26 = int_to_ptr.vmem [resolvable:$false] %s3575_s26 }
  0x33   : > { %s3577_s23 = scalar_lea.vmem %s3576_s26, 6144  ;;  %p3578_p6 = scmp.lt.s32.totalorder %s4054_s19, %s3576_s26 }
  0x34   : > { %p3573_p3 = pnand %p3571_p2, %p4061_p7  ;;  %p3579_p8 = scmp.lt.s32.totalorder %s3577_s23, %s3570_s20 }
  0x36   : > { %p3574_p4 = pneg %p3573_p3  ;;  %p3580_p10 = por %p3579_p8, %p3578_p6 }
  0x38   : > { %p3581_p11 = pnand %p3580_p10, %p3574_p4 }
  0x3a   : > { %3584 = shalt.err (!%p3581_p11)
}
  0x3b   : > { %s3906_s15 = smov 192   ;;  %s3907_s27 = smov 12  }
  0x3c   : > { %s4842_s18 = scalar_lea.sflag [#allocation7], %s4038_s21  ;;  %s2943_s25 = sshll.u32 %s4041_s22, 6 }
  0x3d   : > { %3343 = dma.hbm_to_vmem [thread:$0]  (!%p4044_p5), %s4052_s28, 3072, %s4054_s19, %s4842_s18, %s3906_s15, %s3906_s15, %s3907_s27  }
  0x3e   : > { %s3088_s2 = sshll.u32 %s3903_s16, 10  ;;  %s4843_s4 = sld [smem:[#allocation32_spill]] }
  0x3f   : > { %s491_s14 = scalar_lea.vmem [#allocation9], %s2943_s25  ;;  %s4818_s12 = scalar_lea.sflag [#allocation10], %s4038_s21 }
  0x40   : > { %s498_s1 = sshll.u32 %s491_s14, 4  ;;  %s4093_s1 = int_to_ptr.vmem [resolvable:$true] %s498_s1 }
  0x44   : > { %s4091_s23 = scalar_lea.hbm %s4843_s4, %s3088_s2  ;;  %s3590_s15 = scalar_lea.hbm %s4843_s4, 2048 }
  0x45   : > { %s3585_s11 = scalar_lea.hbm %s4091_s23, 1024  ;;  %p3591_p0 = scmp.lt.u32.totalorder %s4091_s23, %s4843_s4 }
  0x46   : > { %p3586_p9 = scmp.ne.s32.totalorder %s4091_s23, %s3585_s11  ;;  %p3592_p1 = scmp.lt.u32.totalorder %s3590_s15, %s3585_s11 }
  0x47   : > { %p3594_p3 = scmp.lt.u32.totalorder %s3585_s11, %s4091_s23 }
  0x48   : > { %p3588_p12 = pnand %p3586_p9, %p4061_p7  ;;  %p3593_p2 = por %p3592_p1, %p3591_p0 }
  0x4a   : > { %p3589_p13 = pneg %p3588_p12  ;;  %p3595_p4 = por %p3594_p3, %p3593_p2 }
  0x4c   : > { %p3596_p6 = pnand %p3595_p4, %p3589_p13 }
  0x4e   : > { %3599 = shalt.err (!%p3596_p6)
}
  0x4f   : > { %s3600_s14 = scalar_lea.vmem %s4093_s1, 1024  ;;  %s3908_s18 = smov [#allocation9]  }
  0x50   : > { %p3601_p8 = scmp.ne.s32.totalorder %s4093_s1, %s3600_s14  ;;  %s3605_s25 = sshll.u32 %s3908_s18, 4  ;;  %s3606_s25 = int_to_ptr.vmem [resolvable:$false] %s3605_s25 }
  0x51   : > { %s3607_s26 = scalar_lea.vmem %s3606_s25, 2048  ;;  %p3608_p9 = scmp.lt.s32.totalorder %s4093_s1, %s3606_s25 }
  0x52   : > { %p3603_p10 = pnand %p3601_p8, %p4061_p7  ;;  %p3609_p12 = scmp.lt.s32.totalorder %s3607_s26, %s3600_s14 }
  0x54   : > { %p3604_p11 = pneg %p3603_p10  ;;  %p3610_p0 = por %p3609_p12, %p3608_p9 }
  0x56   : > { %p3611_p1 = pnand %p3610_p0, %p3604_p11 }
  0x58   : > { %3614 = shalt.err (!%p3611_p1)
}
  0x59   : > { %s4812_s11 = smov 64   ;;  %s4817_s20 = smov 4  }
  0x5a   : > { %3349 = dma.hbm_to_vmem [thread:$0]  (!%p4044_p5), %s4091_s23, 1024, %s4093_s1, %s4818_s12, %s4812_s11, %s4812_s11, %s4817_s20  }
  0x5b   : > { %s2949_s28 = sshll.u32 %s4041_s22, 1  ;;  %s3090_s19 = sshll.u32 %s3903_s16, 5 }
  0x5c   : > { %s4844_s7 = sld [smem:[#allocation33_spill]]  ;;  %s539_s14 = scalar_lea.vmem [#allocation12], %s2949_s28 }
  0x5d   : > { %s547_s18 = sshll.u32 %s539_s14, 4  ;;  %s4815_s25 = scalar_lea.sflag [#allocation13], %s4038_s21  ;;  %s548_s18 = int_to_ptr.vmem [resolvable:$true] %s547_s18 }
  0x62   : > { %s4127_s27 = scalar_lea.hbm %s4844_s7, %s3090_s19  ;;  %s3620_s11 = scalar_lea.hbm %s4844_s7, 64 }
  0x63   : > { %s3615_s26 = scalar_lea.hbm %s4127_s27, 32  ;;  %p3621_p4 = scmp.lt.u32.totalorder %s4127_s27, %s4844_s7 }
  0x64   : > { %p3616_p13 = scmp.ne.s32.totalorder %s4127_s27, %s3615_s26  ;;  %p3622_p6 = scmp.lt.u32.totalorder %s3620_s11, %s3615_s26 }
  0x65   : > { %p3624_p10 = scmp.lt.u32.totalorder %s3615_s26, %s4127_s27 }
  0x66   : > { %p3618_p2 = pnand %p3616_p13, %p4061_p7  ;;  %p3623_p8 = por %p3622_p6, %p3621_p4 }
  0x68   : > { %p3619_p3 = pneg %p3618_p2  ;;  %p3625_p11 = por %p3624_p10, %p3623_p8 }
  0x6a   : > { %p3626_p9 = pnand %p3625_p11, %p3619_p3 }
  0x6c   : > { %3629 = shalt.err (!%p3626_p9)
}
  0x6d   : > { %s3630_s28 = scalar_lea.vmem %s548_s18, 32  ;;  %s3911_s2 = smov [#allocation12]  }
  0x6e   : > { %p3631_p12 = scmp.ne.s32.totalorder %s548_s18, %s3630_s28  ;;  %s3635_s14 = sshll.u32 %s3911_s2, 4  ;;  %s3636_s14 = int_to_ptr.vmem [resolvable:$false] %s3635_s14 }
  0x6f   : > { %s3637_s1 = scalar_lea.vmem %s3636_s14, 64  ;;  %p3638_p13 = scmp.lt.s32.totalorder %s548_s18, %s3636_s14 }
  0x70   : > { %p3633_p0 = pnand %p3631_p12, %p4061_p7  ;;  %p3639_p2 = scmp.lt.s32.totalorder %s3637_s1, %s3630_s28 }
  0x72   : > { %p3634_p1 = pneg %p3633_p0  ;;  %p3640_p5 = por %p3639_p2, %p3638_p13 }
  0x74   : > { %p3641_p4 = pnand %p3640_p5, %p3634_p1 }
  0x76   : > { %3644 = shalt.err (!%p3641_p4)
}
  0x77   : > { %p4845_p6 = scmp.ne.s32.totalorder %s4839_s24, 0  ;;  %s2955_s11 = sshll.u32 %s3903_s16, 4 }
  0x78   : > { %s578_s26 = scalar_lea.vmem [#allocation15], %s4041_s22  ;;  %s4846_s9 = sld [smem:[#allocation34_spill]] }
  0x79   : > { %3355 = dma.hbm_to_vmem [thread:$0]  (!%p4845_p6), %s4127_s27, 32, %s548_s18, %s4815_s25  }
  0x7a   : > { %s585_s23 = sshll.u32 %s578_s26, 4  ;;  %s4816_s2 = scalar_lea.sflag [#allocation16], %s4038_s21  ;;  %s586_s23 = int_to_ptr.vmem [resolvable:$true] %s585_s23 }
  0x7e   : > { %s4154_s28 = scalar_lea.hbm %s4846_s9, %s2955_s11  ;;  %s3650_s1 = scalar_lea.hbm %s4846_s9, 32 }
  0x7f   : > { %s3645_s14 = scalar_lea.hbm %s4154_s28, 16  ;;  %p3651_p10 = scmp.lt.u32.totalorder %s4154_s28, %s4846_s9 }
  0x80   : > { %p3646_p5 = scmp.ne.s32.totalorder %s4154_s28, %s3645_s14  ;;  %p3652_p11 = scmp.lt.u32.totalorder %s3650_s1, %s3645_s14 }
  0x81   : > { %p3654_p12 = scmp.lt.u32.totalorder %s3645_s14, %s4154_s28 }
  0x82   : > { %p3648_p3 = pnand %p3646_p5, %p4061_p7  ;;  %p3653_p9 = por %p3652_p11, %p3651_p10 }
  0x84   : > { %p3649_p8 = pneg %p3648_p3  ;;  %p3655_p0 = por %p3654_p12, %p3653_p9 }
  0x86   : > { %p3656_p1 = pnand %p3655_p0, %p3649_p8 }
  0x88   : > { %3659 = shalt.err (!%p3656_p1)
}
  0x89   : > { %s3660_s11 = scalar_lea.vmem %s586_s23, 16  ;;  %s3912_s15 = smov [#allocation15]  }
  0x8a   : > { %p3661_p13 = scmp.ne.s32.totalorder %s586_s23, %s3660_s11  ;;  %s3665_s19 = sshll.u32 %s3912_s15, 4  ;;  %s3666_s19 = int_to_ptr.vmem [resolvable:$false] %s3665_s19 }
  0x8b   : > { %s3667_s27 = scalar_lea.vmem %s3666_s19, 32  ;;  %p3668_p5 = scmp.lt.s32.totalorder %s586_s23, %s3666_s19 }
  0x8c   : > { %p3663_p2 = pnand %p3661_p13, %p4061_p7  ;;  %p3669_p3 = scmp.lt.s32.totalorder %s3667_s27, %s3660_s11 }
  0x8e   : > { %p3664_p4 = pneg %p3663_p2  ;;  %p3670_p6 = por %p3669_p3, %p3668_p5 }
  0x90   : > { %p3671_p10 = pnand %p3670_p6, %p3664_p4 }
  0x92   : > { %3674 = shalt.err (!%p3671_p10)
}
  0x93   : > { %p4847_p11 = scmp.ne.s32.totalorder %s4839_s24, 0  ;;  %s4177_s25 = sadd.s32 4294967295, %s3903_s16  }
  0x94   : > { %p4819_p6 = scmp.eq.s32.totalorder %s4177_s25, 0  ;;  %p100_p8 = scmp.ne.s32.totalorder %s3895_s30, %s3891_s29 }
  0x95   : > { %3361 = dma.hbm_to_vmem [thread:$0]  (!%p4847_p11), %s4154_s28, 16, %s586_s23, %s4816_s2  }
  0x96   : > { %p2938_p9 = scmp.ge.s32.totalorder %s3903_s16, 1  ;;  %p418_p12 = scmp.lt.s32.totalorder %s3903_s16, 3 }
  0x97   : > { %p4187_p1 = por %p4819_p6, %p100_p8  ;;  %s3913_s23 = smov [#allocation3]  }
  0x98   : > { %p4191_p13 = pnand %p2938_p9, %p418_p12  ;;  %s430_s28 = sshll.u32 %s3913_s23, 4  ;;  %s4195_s28 = int_to_ptr.vmem [resolvable:$true] %s430_s28 }
  0x99   : > { %s4848_s14 = scalar_select %p4187_p1, 1, 0 }
  0x9a   : > { %s4849_s18 = scalar_select %p4191_p13, 1, 0 }
  0x9b   : > { %p3336_p2 = pneg %p4191_p13  ;;  %s3308_s29 = smul.u32 3, %s4041_s22 }
  0x9c   : > { %s3309_s11 = smul.u32 48, %s3903_s16  ;;  %s4851_s3 = sld [smem:[#allocation31_spill]] }
  0x9d   : > { %p4203_p4 = pnand %p3336_p2, %p4819_p6  ;;  %s4852_s0 = sld [smem:[#allocation28_spill]] }
  0x9f   : > { %p3677_p3 = pneg %p4203_p4 }
  0xa2   : > { %s4211_s27 = scalar_lea.hbm %s4851_s3, %s3309_s11 }
  0xa3   : > { %s3675_s20 = scalar_lea.hbm %s4852_s0, 256 }
  0xa4   : > { %p3676_p5 = scmp.ne.s32.totalorder %s4852_s0, %s3675_s20  ;;  %p3682_p9 = scmp.lt.u32.totalorder %s3675_s20, %s4852_s0 }
  0xa6   : > { %p3678_p10 = pnand %p3677_p3, %p3676_p5 }
  0xa8   : > { %p3679_p8 = pneg %p3678_p10 }
  0xaa   : > { %p3684_p12 = pnand %p3682_p9, %p3679_p8 }
  0xac   : > { %3687 = shalt.err (!%p3684_p12)
}
  0xad   : > { %s3688_s11 = scalar_lea.vmem %s4195_s28, 256  ;;  %p3696_p1 = scmp.lt.s32.totalorder %s4195_s28, %s4195_s28 }
  0xae   : > { %p3689_p2 = scmp.ne.s32.totalorder %s4195_s28, %s3688_s11  ;;  %p3697_p13 = scmp.lt.s32.totalorder %s3688_s11, %s3688_s11 }
  0xb0   : > { %p3691_p0 = pnand %p3689_p2, %p3677_p3  ;;  %p3698_p11 = por %p3697_p13, %p3696_p1 }
  0xb2   : > { %p3692_p6 = pneg %p3691_p0 }
  0xb4   : > { %p3699_p7 = pnand %p3698_p11, %p3692_p6 }
  0xb6   : > { %3702 = shalt.err (!%p3699_p7)
}
  0xb7   : > { %s3914_s4 = smov 128   ;;  %s3915_s7 = smov 8  }
  0xb8   : > { %3339 = dma.hbm_to_vmem [thread:$0]  (!%p4203_p4), %s4852_s0, 256, %s4195_s28, [#allocation4], %s3914_s4, %s3914_s4, %s3915_s7  }
  0xb9   : > { %s472_s2 = scalar_lea.vmem [#allocation8], %s3308_s29  ;;  %s3089_s15 = sshll.u32 %s3903_s16, 11 }
  0xba   : > { %s480_s1 = sshll.u32 %s472_s2, 4  ;;  %s4243_s11 = scalar_lea.hbm %s4798_s6, %s3089_s15  ;;  %s481_s1 = int_to_ptr.vmem [resolvable:$true] %s480_s1 }
  0xbb   : > { %s3703_s9 = scalar_lea.hbm %s4211_s27, 48  ;;  %p4853_p11 = scmp.ne.s32.totalorder %s4841_s17, 0 }
  0xbc   : > { %p3704_p7 = scmp.ne.s32.totalorder %s4211_s27, %s3703_s9  ;;  %s3708_s12 = scalar_lea.hbm %s4851_s3, 96 }
  0xbd   : > { %p3709_p1 = scmp.lt.u32.totalorder %s4211_s27, %s4851_s3  ;;  %p3710_p13 = scmp.lt.u32.totalorder %s3708_s12, %s3703_s9 }
  0xbe   : > { %p3706_p6 = pnand %p3704_p7, %p4853_p11  ;;  %p3712_p5 = scmp.lt.u32.totalorder %s3703_s9, %s4211_s27 }
  0xbf   : > { %p3711_p4 = por %p3710_p13, %p3709_p1 }
  0xc0   : > { %p3707_p0 = pneg %p3706_p6 }
  0xc1   : > { %p3713_p3 = por %p3712_p5, %p3711_p4 }
  0xc3   : > { %p3714_p10 = pnand %p3713_p3, %p3707_p0 }
  0xc5   : > { %3717 = shalt.err (!%p3714_p10)
}
  0xc6   : > { %s3718_s20 = scalar_lea.vmem %s481_s1, 48  ;;  %s3916_s2 = smov [#allocation8]  }
  0xc7   : > { %p3719_p8 = scmp.ne.s32.totalorder %s481_s1, %s3718_s20  ;;  %s3723_s19 = sshll.u32 %s3916_s2, 4  ;;  %s3724_s19 = int_to_ptr.vmem [resolvable:$false] %s3723_s19 }
  0xc8   : > { %s3725_s10 = scalar_lea.vmem %s3724_s19, 96  ;;  %p3726_p2 = scmp.lt.s32.totalorder %s481_s1, %s3724_s19 }
  0xc9   : > { %p3721_p9 = pnand %p3719_p8, %p4853_p11  ;;  %p3727_p7 = scmp.lt.s32.totalorder %s3725_s10, %s3718_s20 }
  0xcb   : > { %p3722_p12 = pneg %p3721_p9  ;;  %p3728_p6 = por %p3727_p7, %p3726_p2 }
  0xcd   : > { %p3729_p1 = pnand %p3728_p6, %p3722_p12 }
  0xcf   : > { %3732 = shalt.err (!%p3729_p1)
}
  0xd0   : > { %p4854_p13 = scmp.ne.s32.totalorder %s4839_s24, 0  ;;  %s4855_s9 = scalar_lea.sflag [#allocation7], %s4038_s21 }
  0xd1   : > { %s4856_s23 = sshll.u32 %s4041_s22, 7  ;;  %s4273_s20 = scalar_lea.hbm %s4800_s8, %s3089_s15 }
  0xd2   : > { %3346 = dma.hbm_to_vmem [thread:$0]  (!%p4854_p13), %s4211_s27, 48, %s481_s1, %s4855_s9  }
  0xd3   : > { %s518_s26 = scalar_lea.vmem [#allocation11], %s4856_s23  ;;  %s3733_s2 = scalar_lea.hbm %s4243_s11, 2048 }
  0xd4   : > { %s525_s12 = sshll.u32 %s518_s26, 4  ;;  %p3734_p0 = scmp.ne.s32.totalorder %s4243_s11, %s3733_s2  ;;  %s4266_s12 = int_to_ptr.vmem [resolvable:$true] %s525_s12 }
  0xd5   : > { %s3738_s27 = scalar_lea.hbm %s4798_s6, 4096  ;;  %p3739_p3 = scmp.lt.u32.totalorder %s4243_s11, %s4798_s6 }
  0xd6   : > { %p3736_p4 = pnand %p3734_p0, %p4853_p11  ;;  %p3740_p10 = scmp.lt.u32.totalorder %s3738_s27, %s3733_s2 }
  0xd7   : > { %p3742_p9 = scmp.lt.u32.totalorder %s3733_s2, %s4243_s11 }
  0xd8   : > { %p3737_p5 = pneg %p3736_p4  ;;  %p3741_p8 = por %p3740_p10, %p3739_p3 }
  0xda   : > { %p3743_p12 = por %p3742_p9, %p3741_p8 }
  0xdc   : > { %p3744_p2 = pnand %p3743_p12, %p3737_p5 }
  0xde   : > { %3747 = shalt.err (!%p3744_p2)
}
  0xdf   : > { %s3748_s15 = scalar_lea.vmem %s4266_s12, 2048  ;;  %s3917_s23 = smov [#allocation11]  }
  0xe0   : > { %p3749_p7 = scmp.ne.s32.totalorder %s4266_s12, %s3748_s15  ;;  %s3753_s26 = sshll.u32 %s3917_s23, 4  ;;  %s3754_s26 = int_to_ptr.vmem [resolvable:$false] %s3753_s26 }
  0xe1   : > { %s3755_s28 = scalar_lea.vmem %s3754_s26, 4096  ;;  %p3756_p0 = scmp.lt.s32.totalorder %s4266_s12, %s3754_s26 }
  0xe2   : > { %p3751_p6 = pnand %p3749_p7, %p4853_p11  ;;  %p3757_p4 = scmp.lt.s32.totalorder %s3755_s28, %s3748_s15 }
  0xe4   : > { %p3752_p1 = pneg %p3751_p6  ;;  %p3758_p3 = por %p3757_p4, %p3756_p0 }
  0xe6   : > { %p3759_p10 = pnand %p3758_p3, %p3752_p1 }
  0xe8   : > { %3762 = shalt.err (!%p3759_p10)
}
  0xe9   : > { %s4857_s29 = scalar_lea.sflag [#allocation10], %s4038_s21  ;;  %s4858_s2 = sshll.u32 %s4041_s22, 7 }
  0xea   : > { %3352 = dma.hbm_to_vmem [thread:$0]  (!%p4854_p13), %s4243_s11, 2048, %s4266_s12, %s4857_s29, %s3914_s4, %s3914_s4, %s3915_s7  }
  0xeb   : > { %s558_s19 = scalar_lea.vmem [#allocation14], %s4858_s2  ;;  %s2956_s27 = sshll.u32 %s4041_s22, 3 }
  0xec   : > { %s565_s10 = sshll.u32 %s558_s19, 4  ;;  %s3763_s1 = scalar_lea.hbm %s4273_s20, 2048  ;;  %s4304_s10 = int_to_ptr.vmem [resolvable:$true] %s565_s10 }
  0xed   : > { %p3764_p5 = scmp.ne.s32.totalorder %s4273_s20, %s3763_s1  ;;  %s3768_s23 = scalar_lea.hbm %s4800_s8, 4096 }
  0xee   : > { %p3769_p12 = scmp.lt.u32.totalorder %s4273_s20, %s4800_s8  ;;  %p3770_p2 = scmp.lt.u32.totalorder %s3768_s23, %s3763_s1 }
  0xef   : > { %p3766_p8 = pnand %p3764_p5, %p4853_p11  ;;  %p3772_p6 = scmp.lt.u32.totalorder %s3763_s1, %s4273_s20 }
  0xf0   : > { %p3771_p7 = por %p3770_p2, %p3769_p12 }
  0xf1   : > { %p3767_p9 = pneg %p3766_p8 }
  0xf2   : > { %p3773_p1 = por %p3772_p6, %p3771_p7 }
  0xf4   : > { %p3774_p0 = pnand %p3773_p1, %p3767_p9 }
  0xf6   : > { %3777 = shalt.err (!%p3774_p0)
}
  0xf7   : > { %s3778_s4 = scalar_lea.vmem %s4304_s10, 2048  ;;  %s3918_s7 = smov [#allocation14]  }
  0xf8   : > { %p3779_p4 = scmp.ne.s32.totalorder %s4304_s10, %s3778_s4  ;;  %s3783_s11 = sshll.u32 %s3918_s7, 4  ;;  %s3784_s11 = int_to_ptr.vmem [resolvable:$false] %s3783_s11 }
  0xf9   : > { %s3785_s12 = scalar_lea.vmem %s3784_s11, 4096  ;;  %p3786_p5 = scmp.lt.s32.totalorder %s4304_s10, %s3784_s11 }
  0xfa   : > { %p3781_p3 = pnand %p3779_p4, %p4853_p11  ;;  %p3787_p8 = scmp.lt.s32.totalorder %s3785_s12, %s3778_s4 }
  0xfc   : > { %p3782_p10 = pneg %p3781_p3  ;;  %p3788_p12 = por %p3787_p8, %p3786_p5 }
  0xfe   : > { %p3789_p2 = pnand %p3788_p12, %p3782_p10 }
 0x100   : > { %3792 = shalt.err (!%p3789_p2)
}
 0x101   : > { %s4859_s29 = smov 4   ;;  %s4860_s2 = smov 64  }
 0x102   : > { %s4861_s19 = scalar_lea.sflag [#allocation13], %s4038_s21  ;;  %s2957_s1 = sshll.u32 %s3903_s16, 7 }
 0x103   : > { %3358 = dma.hbm_to_vmem [thread:$0]  (!%p4854_p13), %s4273_s20, 2048, %s4304_s10, %s4861_s19, %s4860_s2, %s4860_s2, %s4859_s29  }
 0x104   : > { %s617_s9 = scalar_lea.vmem [#allocation17], %s2956_s27  ;;  %s622_s28 = scalar_lea.hbm %s4805_s13, %s2957_s1 }
 0x105   : > { %s624_s15 = sshll.u32 %s617_s9, 4  ;;  %s3793_s4 = scalar_lea.hbm %s622_s28, 128  ;;  %s625_s15 = int_to_ptr.vmem [resolvable:$true] %s624_s15 }
 0x106   : > { %p3794_p9 = scmp.ne.s32.totalorder %s622_s28, %s3793_s4  ;;  %s3798_s12 = scalar_lea.hbm %s4805_s13, 256 }
 0x107   : > { %p3799_p1 = scmp.lt.u32.totalorder %s622_s28, %s4805_s13  ;;  %p3800_p0 = scmp.lt.u32.totalorder %s3798_s12, %s3793_s4 }
 0x108   : > { %p3796_p7 = pnand %p3794_p9, %p4853_p11  ;;  %p3802_p3 = scmp.lt.u32.totalorder %s3793_s4, %s622_s28 }
 0x109   : > { %p3801_p4 = por %p3800_p0, %p3799_p1 }
 0x10a   : > { %p3797_p6 = pneg %p3796_p7 }
 0x10b   : > { %p3803_p10 = por %p3802_p3, %p3801_p4 }
 0x10d   : > { %p3804_p5 = pnand %p3803_p10, %p3797_p6 }
 0x10f   : > { %3807 = shalt.err (!%p3804_p5)
}
 0x110   : > { %s3808_s16 = scalar_lea.vmem %s625_s15, 128  ;;  %s3919_s22 = smov [#allocation17]  }
 0x111   : > { %p3809_p8 = scmp.ne.s32.totalorder %s625_s15, %s3808_s16  ;;  %s3813_s10 = sshll.u32 %s3919_s22, 4  ;;  %s3814_s10 = int_to_ptr.vmem [resolvable:$false] %s3813_s10 }
 0x112   : > { %s3815_s27 = scalar_lea.vmem %s3814_s10, 256  ;;  %p3816_p9 = scmp.lt.s32.totalorder %s625_s15, %s3814_s10 }
 0x113   : > { %p3811_p12 = pnand %p3809_p8, %p4853_p11  ;;  %p3817_p7 = scmp.lt.s32.totalorder %s3815_s27, %s3808_s16 }
 0x115   : > { %p3812_p2 = pneg %p3811_p12  ;;  %p3818_p13 = por %p3817_p7, %p3816_p9 }
 0x117   : > { %p3819_p0 = pnand %p3818_p13, %p3812_p2 }
 0x119   : > { %3822 = shalt.err (!%p3819_p0)
}
 0x11a   : > { %p4862_p1 = scmp.ne.s32.totalorder %s4839_s24, 0  ;;  %s4863_s0 = scalar_lea.sflag [#allocation16], %s4038_s21 }
 0x11b   : > { %p4864_p6 = scmp.ne.s32.totalorder %s4849_s18, 0 }
 0x11c   : > { %3364 = dma.hbm_to_vmem [thread:$0]  (!%p4862_p1), %s622_s28, 128, %s625_s15, %s4863_s0  }
 0x11d   : > { %633 = sbr.rel (%p4864_p6) target bundleno = 3000 (0xbb8), region = 76  ;;  %p4865_p11 = scmp.eq.s32.totalorder (!%p4864_p6), %s4177_s25, 0 }
 0x124   : > { %3866 = dma.done.wait (%p4865_p11), [#allocation4], 256   ;;  %p4866_p4 = pmov %p4865_p11 }
 0x125   : > { %s639_s17 = sand.u32 1, %s4177_s25   ;;  %s4360_s29 = sand.u32 1, %s3895_s30  }
 0x126   : > { %3868 = vsyncadd (%p4866_p4), [#allocation4], 4294967040  ;;  %s3310_s24 = smul.u32 192, %s4360_s29  ;;  %s640_s2 = scalar_lea.sflag [#allocation7], %s639_s17 }
 0x127   : > { %p4867_p13 = scmp.ne.s32.totalorder %s4848_s14, 0 }
 0x128   : > { %s4363_s21 = scalar_lea.vmem [#allocation6], %s3310_s24 }
 0x129   : > { %3870 = dma.done.wait (%p4867_p13), %s640_s2, 3120  }
 0x12a   : > { %3872 = vsyncadd (%p4867_p13), %s640_s2, 4294964176  ;;  %s3311_s18 = smul.u32 3, %s4360_s29  ;;  %s2960_s19 = sshll.u32 %s4360_s29, 6 }
 0x12b   : > { %s658_s9 = scalar_lea.sflag [#allocation10], %s639_s17  ;;  %s4373_s15 = scalar_lea.vmem [#allocation9], %s2960_s19 }
 0x12c   : > { %s4371_s1 = scalar_lea.vmem [#allocation8], %s3311_s18 }
 0x12d   : > { %3874 = dma.done.wait (%p4867_p13), %s658_s9, 3072  }
 0x12e   : > { %3876 = vsyncadd (%p4867_p13), %s658_s9, 4294964224  ;;  %s2961_s23 = sshll.u32 %s4360_s29, 7  ;;  %s2962_s26 = sshll.u32 %s4360_s29, 1 }
 0x12f   : > { %s4381_s28 = scalar_lea.vmem [#allocation11], %s2961_s23  ;;  %s676_s4 = scalar_lea.sflag [#allocation13], %s639_s17 }
 0x130   : > { %s4383_s7 = scalar_lea.vmem [#allocation12], %s2962_s26 }
 0x131   : > { %3878 = dma.done.wait (%p4867_p13), %s676_s4, 2080  }
 0x132   : > { %3880 = vsyncadd (%p4867_p13), %s676_s4, 4294965216  ;;  %s4389_s11 = scalar_lea.vmem [#allocation14], %s2961_s23  ;;  %s694_s12 = scalar_lea.sflag [#allocation16], %s639_s17 }
 0x133   : > { %3882 = dma.done.wait (%p4867_p13), %s694_s12, 144  }
 0x134   : > { %3884 = vsyncadd (%p4867_p13), %s694_s12, 4294967152  ;;  %s2964_s16 = sshll.u32 %s4360_s29, 3  ;;  %p794_p3 = scmp.lt.s32.totalorder %s4177_s25, 1 }
 0x135   : > { %s4868_s14 = sld [smem:[#allocation35_spill]]  ;;  %s4869_s23 = sld [smem:[#allocation36_spill]] }
 0x136   : > { %s4399_s22 = scalar_select %p794_p3, %s4177_s25, 1 }
 0x137   : > { %s4420_s10 = scalar_lea.vmem [#allocation17], %s2964_s16  ;;  %p4871_p10 = scmp.ne.s32.totalorder %s4177_s25, 0 }
 0x138   : > { %s796_s0 = scalar_lea.vmem %s4797_s5, %s4399_s22  ;;  %s4406_s17 = sshll.u32 %s4399_s22, 3  ;;  %v814_v0 = vld [vmem:[#allocation3] sm:$0xff] (!%p4871_p10)  ;;  %v815_v1 = vld [vmem:[#allocation3 + $0x8] sm:$0xff] (!%p4871_p10) }
 0x139   : > { %813 = sbr.rel (%p4871_p10) target bundleno = 320 (0x140), region = 116  ;;  %v816_v2 = vpack.c.bf16 (!%p4871_p10), %v815_v1, %v814_v0 }
 0x13b   : > { %s800_s18 = scalar_lea.vmem %s4868_s14, %s4406_s17  ;;  %s804_s26 = scalar_lea.vmem %s4869_s23, %s4406_s17  ;;  %817 = vst [vmem:[#allocation2] sm:$0xff] (!%p4871_p10), %v816_v2 }
 0x140 PF: > { %v3435_v3 = vld [vmem:[%s4363_s21 + $0x4] ss:$12 sps:$4 sm:$0xff]   ;;  %v3437_v4 = vld [vmem:[%s4363_s21] ss:$12 sps:$4 sm:$0xff]   ;;  %v3920_v5 = vmov 0   ;;  %v3921_v6 = vmov 0.0   ;;  %v855_v30 = vlaneseq }
 0x141   : > { %1030 = vmatprep.mubr.bf16.mxu0 %v3920_v5  ;;  %3170 = vmatprep.subr.bf16.mxu1 %v3921_v6  ;;  %v3438_v7 = vld [vmem:[%s4363_s21 + $0x1c] ss:$12 sps:$4 sm:$0xff]   ;;  %v3440_v8 = vld [vmem:[%s4363_s21 + $0x18] ss:$12 sps:$4 sm:$0xff]   ;;  %v3441_v9 = vld [vmem:[%s4363_s21 + $0x34] ss:$12 sps:$4 sm:$0xff]  }
 0x142   : > { %998 = vmatprep.subr.bf16.mxu0 %v3435_v3  ;;  %3418 = vset.pattern.permute.xlu0 %v3920_v5  ;;  %v3443_v10 = vld [vmem:[%s4363_s21 + $0x30] ss:$12 sps:$4 sm:$0xff]   ;;  %v3444_v11 = vld [vmem:[%s4363_s21 + $0x4c] ss:$12 sps:$4 sm:$0xff]   ;;  %v3446_v12 = vld [vmem:[%s4363_s21 + $0x48] ss:$12 sps:$4 sm:$0xff]  }
 0x143   : > { %999 = vmatpush1.bf16.msra.mxu0 %v3437_v4  ;;  %3419 = vset.pattern.permute.xlu1 %v3920_v5  ;;  %v3459_v13 = vld [vmem:[%s4363_s21 + $0x8] ss:$12 sps:$4 sm:$0xff]   ;;  %v3447_v14 = vld [vmem:[%s4363_s21 + $0x64] ss:$12 sps:$4 sm:$0xff]   ;;  %v3460_v15 = vld [vmem:[%s4363_s21 + $0x20] ss:$12 sps:$4 sm:$0xff]  }
 0x144   : > { %1000 = vmatprep.subr.bf16.mxu0 %v3438_v7  ;;  %3171 = vmatpush3.bf16.msra.mxu1 %v3459_v13  ;;  %v3449_v16 = vld [vmem:[%s4363_s21 + $0x60] ss:$12 sps:$4 sm:$0xff]   ;;  %v3450_v17 = vld [vmem:[%s4363_s21 + $0x7c] ss:$12 sps:$4 sm:$0xff]   ;;  %v3452_v18 = vld [vmem:[%s4363_s21 + $0x78] ss:$12 sps:$4 sm:$0xff]  }
 0x145   : > { %3172 = vmatprep.subr.bf16.mxu1 %v3921_v6  ;;  %v3461_v19 = vld [vmem:[%s4363_s21 + $0x38] ss:$12 sps:$4 sm:$0xff]   ;;  %v3453_v20 = vld [vmem:[%s4363_s21 + $0x94] ss:$12 sps:$4 sm:$0xff]   ;;  %v3462_v21 = vld [vmem:[%s4363_s21 + $0x50] ss:$12 sps:$4 sm:$0xff]  }
 0x146   : > { %v3455_v22 = vld [vmem:[%s4363_s21 + $0x90] ss:$12 sps:$4 sm:$0xff]   ;;  %v3456_v23 = vld [vmem:[%s4363_s21 + $0xac] ss:$12 sps:$4 sm:$0xff]   ;;  %v3463_v24 = vld [vmem:[%s4363_s21 + $0x68] ss:$12 sps:$4 sm:$0xff]  }
 0x147   : > { %1001 = vmatpush1.bf16.msra.mxu0 %v3440_v8  ;;  %v3458_v25 = vld [vmem:[%s4363_s21 + $0xa8] ss:$12 sps:$4 sm:$0xff]   ;;  %v3464_v26 = vld [vmem:[%s4363_s21 + $0x80] ss:$12 sps:$4 sm:$0xff]   ;;  %v3465_v28 = vld [vmem:[%s4363_s21 + $0x98] ss:$12 sps:$4 sm:$0xff]  }
 0x148   : > { %1002 = vmatprep.subr.bf16.mxu0 %v3441_v9  ;;  %3173 = vmatpush3.bf16.msra.mxu1 %v3460_v15  ;;  %v4454_v27 = vld [vmem:[#allocation2] sm:$0xff]  ;;  %v3466_v29 = vld [vmem:[%s4363_s21 + $0xb0] ss:$12 sps:$4 sm:$0xff]   ;;  %vm3922_vm0 = vmmov 0   ;;  %v4472_v31 = vshrl.u32 %v855_v30, 7  ;;  %vm1154_vm1 = vcmask 261120  }
 0x149   : > { %3174 = vmatprep.subr.bf16.mxu1 %v3921_v6  ;;  %3186 = vmatprep.mubr.msk.bf16.mxu1 %vm3922_vm0, %v3921_v6  ;;  %v853_v33 = vld [vmem:[%s4371_s1] sm:$0x7]  ;;  %s3923_s21 = smov 64   ;;  %s3924_s1 = smov 96   ;;  %vm1713_vm2 = vcmask 1043456   ;;  %vm1613_vm4 = vcmask 64512  }
 0x14a   : > { %v861_v32 = vsub.s32 1, %v4472_v31  ;;  %v857_v34 = vsub.s32 0, %v4472_v31  ;;  %s3925_s20 = smov 32   ;;  %s4872_s24 = sld [smem:[#allocation29_spill]]  ;;  %v865_v61 = vsub.s32 2, %v4472_v31  ;;  %vm2105_vm12 = vcmask 523264  }
 0x14b   : > { %1003 = vmatpush1.bf16.msra.mxu0 %v3443_v10  ;;  %vm2108_vm13 = vcmask 785408   ;;  %p3083_p5 = scmp.ne.s32.totalorder %s4177_s25, 1 }
 0x14c   : > { %1004 = vmatprep.subr.bf16.mxu0 %v3444_v11  ;;  %3175 = vmatpush3.bf16.msra.mxu1 %v3461_v19  ;;  %v862_v35 = vrot.slane %v853_v33, %v861_v32  ;;  %v858_v36 = vrot.slane %v853_v33, %v857_v34  ;;  %v866_v62 = vrot.slane %v853_v33, %v865_v61 }
 0x14d   : > { %3176 = vmatprep.subr.bf16.mxu1 %v3921_v6 }
 0x14f   : > { %1005 = vmatpush1.bf16.msra.mxu0 %v3446_v12 }
 0x150   : > { %1006 = vmatprep.subr.bf16.mxu0 %v3447_v14  ;;  %3177 = vmatpush3.bf16.msra.mxu1 %v3462_v21  ;;  %v3025_v52 = vld [vmem:[%s4872_s24] ss:$0 sm:$0xff]  ;;  %v3026_v53 = vld [vmem:[%s4872_s24 + $0x1] ss:$0 sm:$0xff]  ;;  %v3027_v55 = vld [vmem:[%s4872_s24 + $0x2] ss:$0 sm:$0xff] }
 0x151   : > { %3178 = vmatprep.subr.bf16.mxu1 %v3921_v6  ;;  %v3028_v56 = vld [vmem:[%s4872_s24 + $0x3] ss:$0 sm:$0xff]  ;;  %v3029_v57 = vld [vmem:[%s4872_s24 + $0x4] ss:$0 sm:$0xff]  ;;  %v3030_v58 = vld [vmem:[%s4872_s24 + $0x5] ss:$0 sm:$0xff] }
 0x152   : > { %v3031_v59 = vld [vmem:[%s4872_s24 + $0x6] ss:$0 sm:$0xff]  ;;  %v3032_v60 = vld [vmem:[%s4872_s24 + $0x7] ss:$0 sm:$0xff] }
 0x153   : > { %1007 = vmatpush1.bf16.msra.mxu0 %v3449_v16 }
 0x154   : > { %1008 = vmatprep.subr.bf16.mxu0 %v3450_v17  ;;  %3179 = vmatpush3.bf16.msra.mxu1 %v3463_v24 }
 0x155   : > { %3180 = vmatprep.subr.bf16.mxu1 %v3921_v6 }
 0x157   : > { %1009 = vmatpush1.bf16.msra.mxu0 %v3452_v18 }
 0x158   : > { %1010 = vmatprep.subr.bf16.mxu0 %v3453_v20  ;;  %3181 = vmatpush3.bf16.msra.mxu1 %v3464_v26 }
 0x159   : > { %3182 = vmatprep.subr.bf16.mxu1 %v3921_v6 }
 0x15b   : > { %1011 = vmatpush1.bf16.msra.mxu0 %v3455_v22 }
 0x15c   : > { %1012 = vmatprep.subr.bf16.mxu0 %v3456_v23  ;;  %3183 = vmatpush3.bf16.msra.mxu1 %v3465_v28 }
 0x15d   : > { %3184 = vmatprep.subr.bf16.mxu1 %v3921_v6 }
 0x15f   : > { %1013 = vmatpush1.bf16.msra.mxu0 %v3458_v25 }
 0x160   : > { %3214 = vmatprep.subr.bf16.mxu0 %v3921_v6  ;;  %3185 = vmatpush3.bf16.msra.mxu1 %v3466_v29 }
 0x161   : > { %3190 = vmatprep.subr.bf16.mxu1 %v3921_v6 }
 0x162   : > { %1031 = vmatmul.mubr.bf16.vlgmr.msra.gmra.mrb[0].mxu0 %v4454_v27 }
 0x163   : > { %3216 = vmatprep.mubr.msk.bf16.mxu0 %vm3922_vm0, %v3921_v6  ;;  %3187 = vmatmul.mubr.bf16.vlgmr.msra.gmra.mrb[0].mxu1 %v4454_v27 }
 0x164   : > { %3192 = vmatprep.mubr.msk.bf16.mxu1 %vm3922_vm0, %v3921_v6 }
 0x235   : > { %v1032_v37 = vpop.f32.mrb[0].mxu0 }
 0x236   : > { %v1034_v38 = vpop.f32.mrb[1].mxu0  ;;  %v1033_v41 = vadd.f32 %v1032_v37, %v858_v36  ;;  %v1075_v63 = vpop.f32.mrb[0].mxu1 }
 0x237   : > { %v1035_v39 = vadd.f32 %v1034_v38, %v862_v35  ;;  %v1036_v40 = vpop.f32.mrb[2].mxu0  ;;  %v1076_v0 = vadd.f32 %v1075_v63, %v866_v62  ;;  %v3188_v1 = vpop.f32.mrb[1].mxu1 }
 0x238   : > { %v1037_v42 = vadd.f32 %v1036_v40, %v858_v36  ;;  %v1038_v43 = vpop.f32.mrb[3].mxu0  ;;  %v3092_v50 = vpack.c.bf16 %v1033_v41, %v1033_v41  ;;  %v1078_v2 = vpop.f32.mrb[2].mxu1 }
 0x239   : > { %v3094_v44 = vpack.c.bf16 %v1035_v39, %v1035_v39  ;;  %v1039_v45 = vadd.f32 %v1038_v43, %v862_v35  ;;  %v1079_v3 = vadd.f32 %v1078_v2, %v866_v62  ;;  %v3189_v4 = vpop.f32.mrb[3].mxu1  ;;  %v3096_v24 = vpack.c.bf16 %v1076_v0, %v1076_v0 }
 0x23a   : > { %v1082_v46 = vpack.c.bf16 %v1037_v42, %v1033_v41  ;;  %v3093_v54 = vpack.c.bf16 %v1037_v42, %v1037_v42  ;;  %v4559_v41 = vand.u32 127, %v855_v30 }
 0x23b   : > { %v1083_v47 = vpack.c.bf16 %v1039_v45, %v1035_v39  ;;  %v1159_v48 = vsel %vm1154_vm1, %v3094_v44, 0  ;;  %v3095_v49 = vpack.c.bf16 %v1039_v45, %v1039_v45  ;;  %v4522_v7 = vpack.c.bf16 %v1079_v3, %v1076_v0 }
 0x23c   : > { %3191 = vmatpush3.bf16.xpose.msra.mxu1 %v1159_v48  ;;  %v1715_v29 = vsel %vm1713_vm2, %v3096_v24, 0  ;;  %v3097_v38 = vpack.c.bf16 %v1079_v3, %v1079_v3 }
 0x23d   : > { %1111 = vrot.lane.b32.xlu1 %v1083_v47, %s3923_s21  ;;  %1109 = vrot.lane.b32.xlu0 %v1083_v47, %s3924_s1  ;;  %v1205_v51 = vsel %vm1154_vm1, %v3095_v49, 0 }
 0x23e   : > { %3196 = vmatprep.subr.bf16.mxu1 %v3921_v6  ;;  %v1761_v40 = vsel %vm1713_vm2, %v3097_v38, 0 }
 0x241   : > { %1088 = vrot.lane.b32.xlu1 %v1082_v46, %s3923_s21  ;;  %1086 = vrot.lane.b32.xlu0 %v1082_v46, %s3924_s1 }
 0x243   : > { %3193 = vmatmul.mubr.msk.bf16.vlgmr.msra.gmra.mrb[4].mxu1 %vm1154_vm1, %v3092_v50 }
 0x244   : > { %3197 = vmatpush3.bf16.xpose.msra.mxu1 %v1205_v51  ;;  %3198 = vmatprep.mubr.msk.bf16.mxu1 %vm3922_vm0, %v3921_v6 }
 0x245   : > { %1090 = vrot.lane.b32.xlu1 %v1082_v46, %s3925_s20  ;;  %1113 = vrot.lane.b32.xlu0 %v1083_v47, %s3925_s20 }
 0x246   : > { %3202 = vmatprep.subr.bf16.mxu1 %v3921_v6 }
 0x249   : > { %1574 = vperm.xlu0 %3418, %v3025_v52   ;;  %1577 = vperm.xlu1 %3419, %v3026_v53  }
 0x24b   : > { %3199 = vmatmul.mubr.msk.bf16.vlgmr.msra.gmra.mrb[8].mxu1 %vm1154_vm1, %v3093_v54 }
 0x24c   : > { %3204 = vmatprep.mubr.msk.bf16.mxu1 %vm3922_vm0, %v3921_v6 }
 0x24d   : > { %1580 = vperm.xlu1 %3419, %v3027_v55   ;;  %1583 = vperm.xlu0 %3418, %v3028_v56  }
 0x251   : > { %1586 = vperm.xlu1 %3419, %v3029_v57   ;;  %1589 = vperm.xlu0 %3418, %v3030_v58  }
 0x255   : > { %1592 = vperm.xlu1 %3419, %v3031_v59   ;;  %1595 = vperm.xlu0 %3418, %v3032_v60  }
 0x2af   : > { %v1112_v8 = vpop.permute.xlu1 %1111  ;;  %v1110_v9 = vpop.permute.xlu0 %1109 }
 0x2b0   : > { %v3005_v10 = vcombine.low %v1112_v8, %v1112_v8  ;;  %v3003_v11 = vcombine.low %v1110_v9, %v1110_v9  ;;  %v3004_v16 = vcombine.high %v1110_v9, %v1110_v9  ;;  %v3006_v25 = vcombine.high %v1112_v8, %v1112_v8 }
 0x2b2   : > { %v1251_v12 = vsel %vm1154_vm1, %v3003_v11, 0  ;;  %v1343_v13 = vsel %vm1154_vm1, %v3005_v10, 0  ;;  %v1297_v21 = vsel %vm1154_vm1, %v3004_v16, 0  ;;  %v1389_v33 = vsel %vm1154_vm1, %v3006_v25, 0 }
 0x2b3   : > { %3203 = vmatpush3.bf16.xpose.msra.mxu1 %v1251_v12  ;;  %3215 = vmatpush3.bf16.xpose.msra.mxu0 %v1343_v13  ;;  %v1087_v14 = vpop.permute.xlu0 %1086  ;;  %v1089_v15 = vpop.permute.xlu1 %1088 }
 0x2b4   : > { %3208 = vmatprep.subr.bf16.mxu1 %v3921_v6  ;;  %3226 = vmatprep.subr.bf16.mxu0 %v3921_v6  ;;  %v2997_v18 = vcombine.low %v1089_v15, %v1089_v15  ;;  %v2995_v19 = vcombine.low %v1087_v14, %v1087_v14  ;;  %v2996_v26 = vcombine.high %v1087_v14, %v1087_v14 }
 0x2b5   : > { %v2998_v36 = vcombine.high %v1089_v15, %v1089_v15 }
 0x2b7   : > { %v1114_v17 = vpop.permute.xlu0 %1113  ;;  %v1091_v23 = vpop.permute.xlu1 %1090 }
 0x2b8   : > { %v3007_v20 = vcombine.low %v1114_v17, %v1114_v17  ;;  %v2999_v28 = vcombine.low %v1091_v23, %v1091_v23  ;;  %v3008_v35 = vcombine.high %v1114_v17, %v1114_v17  ;;  %v3000_v39 = vcombine.high %v1091_v23, %v1091_v23 }
 0x2ba   : > { %3205 = vmatmul.mubr.msk.bf16.vlgmr.msra.gmra.mrb[12].mxu1 %vm1154_vm1, %v2995_v19  ;;  %3217 = vmatmul.mubr.msk.bf16.vlgmr.msra.gmra.mrb[4].mxu0 %vm1154_vm1, %v2997_v18  ;;  %v1435_v22 = vsel %vm1154_vm1, %v3007_v20, 0  ;;  %v1481_v37 = vsel %vm1154_vm1, %v3008_v35, 0 }
 0x2bb   : > { %3209 = vmatpush3.bf16.xpose.msra.mxu1 %v1297_v21  ;;  %3227 = vmatpush3.bf16.xpose.msra.mxu0 %v1435_v22 }
 0x2bc   : > { %3210 = vmatprep.mubr.msk.bf16.mxu1 %vm3922_vm0, %v3921_v6  ;;  %3228 = vmatprep.mubr.msk.bf16.mxu0 %vm3922_vm0, %v3921_v6 }
 0x2bd   : > { %3220 = vmatprep.subr.bf16.mxu1 %v3921_v6  ;;  %3238 = vmatprep.subr.bf16.mxu0 %v3921_v6 }
 0x2c2   : > { %3211 = vmatmul.mubr.msk.bf16.vlgmr.msra.gmra.mrb[16].mxu1 %vm1154_vm1, %v2996_v26  ;;  %3229 = vmatmul.mubr.msk.bf16.vlgmr.msra.gmra.mrb[8].mxu0 %vm1154_vm1, %v2999_v28 }
 0x2c3   : > { %3221 = vmatpush3.bf16.xpose.msra.mxu1 %v1389_v33  ;;  %3222 = vmatprep.mubr.msk.bf16.mxu1 %vm3922_vm0, %v3921_v6 }
 0x2c4   : > { %3232 = vmatprep.subr.bf16.mxu1 %v3921_v6  ;;  %3239 = vmatpush3.bf16.msra.mxu0 %v1715_v29 }
 0x2c5   : > { %3240 = vmatprep.mubr.msk.bf16.mxu0 %vm3922_vm0, %v3921_v6  ;;  %3250 = vmatprep.subr.bf16.mxu0 %v3921_v6 }
 0x2c8   : > { %v1575_v42 = vpop.permute.xlu0 %1574  ;;  %v1578_v50 = vpop.permute.xlu1 %1577 }
 0x2c9   : > { %vm1597_vm3 = vcmp.lt.s32.totalorder %v4559_v41, %v1575_v42  ;;  %vm1598_vm5 = vcmp.lt.s32.totalorder %v4559_v41, %v1578_v50 }
 0x2ca   : > { %3223 = vmatmul.mubr.msk.bf16.vlgmr.msra.gmra.mrb[20].mxu1 %vm1154_vm1, %v2998_v36 }
 0x2cb   : > { %3233 = vmatpush3.bf16.xpose.msra.mxu1 %v1481_v37  ;;  %3234 = vmatprep.mubr.msk.bf16.mxu1 %vm3922_vm0, %v3921_v6 }
 0x2cc   : > { %3244 = vmatprep.subr.bf16.mxu1 %v3921_v6  ;;  %v1581_v57 = vpop.permute.xlu1 %1580  ;;  %v1584_v11 = vpop.permute.xlu0 %1583 }
 0x2cd   : > { %vm1599_vm6 = vcmp.lt.s32.totalorder %v4559_v41, %v1581_v57  ;;  %vm1600_vm8 = vcmp.lt.s32.totalorder %v4559_v41, %v1584_v11 }
 0x2d0   : > { %v1587_v58 = vpop.permute.xlu1 %1586  ;;  %v1590_v33 = vpop.permute.xlu0 %1589 }
 0x2d1   : > { %vm1601_vm7 = vcmp.lt.s32.totalorder %v4559_v41, %v1587_v58  ;;  %vm1602_vm10 = vcmp.lt.s32.totalorder %v4559_v41, %v1590_v33 }
 0x2d2   : > { %3235 = vmatmul.mubr.msk.bf16.vlgmr.msra.gmra.mrb[24].mxu1 %vm1154_vm1, %v3000_v39 }
 0x2d3   : > { %3245 = vmatpush3.bf16.msra.mxu1 %v1761_v40  ;;  %3246 = vmatprep.mubr.msk.bf16.mxu1 %vm3922_vm0, %v3921_v6 }
 0x2d4   : > { %3256 = vmatprep.subr.bf16.mxu1 %v3921_v6  ;;  %v1593_v12 = vpop.permute.xlu1 %1592  ;;  %v1596_v42 = vpop.permute.xlu0 %1595 }
 0x2d5   : > { %vm1603_vm9 = vcmp.lt.s32.totalorder %v4559_v41, %v1593_v12  ;;  %vm1604_vm11 = vcmp.lt.s32.totalorder %v4559_v41, %v1596_v42 }
 0x316   : > { %v1195_v43 = vpop.f32.mrb[4].mxu1 }
 0x317   : > { %v1523_v44 = vmul.f32 0.17677669, %v1195_v43  ;;  %v3194_v45 = vpop.f32.mrb[5].mxu1 }
 0x318   : > { %v1198_v46 = vpop.f32.mrb[6].mxu1 }
 0x319   : > { %v3195_v47 = vpop.f32.mrb[7].mxu1  ;;  %v4562_v48 = vsel %vm1597_vm3, %v1523_v44, -1000000.0 }
 0x31a   : > { %v1614_v49 = vsel %vm1613_vm4, %v4562_v48, -inf }
 0x31b   : > { %1615 = vmax.xlane.f32.xlu1 %v1614_v49 }
 0x31e   : > { %v1241_v51 = vpop.f32.mrb[8].mxu1 }
 0x31f   : > { %v1524_v30 = vmul.f32 0.17677669, %v1241_v51  ;;  %v3200_v52 = vpop.f32.mrb[9].mxu1 }
 0x320   : > { %v1244_v53 = vpop.f32.mrb[10].mxu1 }
 0x321   : > { %v3201_v54 = vpop.f32.mrb[11].mxu1  ;;  %v4567_v55 = vsel %vm1598_vm5, %v1524_v30, -1000000.0 }
 0x322   : > { %v1617_v56 = vsel %vm1613_vm4, %v4567_v55, -inf }
 0x323   : > { %1618 = vmax.xlane.f32.xlu0 %v1617_v56 }
 0x38d   : > { %v1287_v59 = vpop.f32.mrb[12].mxu1  ;;  %v1379_v60 = vpop.f32.mrb[4].mxu0 }
 0x38e   : > { %v1525_v61 = vmul.f32 0.17677669, %v1287_v59  ;;  %v1527_v62 = vmul.f32 0.17677669, %v1379_v60  ;;  %v3218_v63 = vpop.f32.mrb[5].mxu0  ;;  %v3206_v0 = vpop.f32.mrb[13].mxu1 }
 0x38f   : > { %v1290_v1 = vpop.f32.mrb[14].mxu1  ;;  %v1382_v2 = vpop.f32.mrb[6].mxu0 }
 0x390   : > { %v3207_v3 = vpop.f32.mrb[15].mxu1  ;;  %v3219_v4 = vpop.f32.mrb[7].mxu0  ;;  %v1607_v8 = vsel %vm1599_vm6, %v1525_v61, -1000000.0  ;;  %v4574_v10 = vsel %vm1601_vm7, %v1527_v62, -1000000.0 }
 0x391   : > { %v1620_v9 = vsel %vm1613_vm4, %v1607_v8, -inf  ;;  %v1626_v15 = vsel %vm1613_vm4, %v4574_v10, -inf }
 0x392   : > { %1621 = vmax.xlane.f32.xlu0 %v1620_v9 }
 0x395   : > { %v1333_v13 = vpop.f32.mrb[16].mxu1  ;;  %v1471_v14 = vpop.f32.mrb[8].mxu0 }
 0x396   : > { %v1526_v16 = vmul.f32 0.17677669, %v1333_v13  ;;  %v1529_v17 = vmul.f32 0.17677669, %v1471_v14  ;;  %1627 = vmax.xlane.f32.xlu0 %v1626_v15  ;;  %v3212_v18 = vpop.f32.mrb[17].mxu1  ;;  %v3230_v19 = vpop.f32.mrb[9].mxu0 }
 0x397   : > { %v1336_v20 = vpop.f32.mrb[18].mxu1  ;;  %v1474_v21 = vpop.f32.mrb[10].mxu0 }
 0x398   : > { %v3213_v22 = vpop.f32.mrb[19].mxu1  ;;  %v3231_v23 = vpop.f32.mrb[11].mxu0  ;;  %v1611_v24 = vsel %vm1603_vm9, %v1529_v17, -1000000.0  ;;  %v1608_v25 = vsel %vm1600_vm8, %v1526_v16, -1000000.0 }
 0x399   : > { %v1632_v26 = vsel %vm1613_vm4, %v1611_v24, -inf  ;;  %v1623_v28 = vsel %vm1613_vm4, %v1608_v25, -inf }
 0x39a   : > { %1633 = vmax.xlane.f32.xlu0 %v1632_v26  ;;  %1624 = vmax.xlane.f32.xlu1 %v1623_v28 }
 0x39d   : > { %v1425_v29 = vpop.f32.mrb[20].mxu1 }
 0x39e   : > { %v1528_v35 = vmul.f32 0.17677669, %v1425_v29  ;;  %v3224_v36 = vpop.f32.mrb[21].mxu1 }
 0x39f   : > { %v1428_v37 = vpop.f32.mrb[22].mxu1 }
 0x3a0   : > { %v3225_v38 = vpop.f32.mrb[23].mxu1  ;;  %v4583_v39 = vsel %vm1602_vm10, %v1528_v35, -1000000.0 }
 0x3a1   : > { %v1629_v40 = vsel %vm1613_vm4, %v4583_v39, -inf }
 0x3a2   : > { %1630 = vmax.xlane.f32.xlu1 %v1629_v40 }
 0x3a5   : > { %v1517_v43 = vpop.f32.mrb[24].mxu1 }
 0x3a6   : > { %v1530_v44 = vmul.f32 0.17677669, %v1517_v43  ;;  %v3236_v45 = vpop.f32.mrb[25].mxu1 }
 0x3a7   : > { %v1520_v46 = vpop.f32.mrb[26].mxu1 }
 0x3a8   : > { %v3237_v47 = vpop.f32.mrb[27].mxu1  ;;  %v1616_v49 = vpop.xlane.xlu1 %1615  ;;  %v4588_v50 = vsel %vm1604_vm11, %v1530_v44, -1000000.0 }
 0x3a9   : > { %v1638_v51 = vsub.f32 %v4562_v48, %v1616_v49  ;;  %v1635_v30 = vsel %vm1613_vm4, %v4588_v50, -inf }
 0x3aa   : > { %1636 = vmax.xlane.f32.xlu1 %v1635_v30 }
 0x3ab   : > { %v1646_v52 = vmul.f32 1.442695, %v1638_v51 }
 0x3ad   : > { %3515 = vpow2.f32 %v1646_v52 }
 0x3b0   : > { %v1619_v53 = vpop.xlane.xlu0 %1618 }
 0x3b1   : > { %v1639_v54 = vsub.f32 %v4567_v55, %v1619_v53 }
 0x3b3   : > { %v1648_v56 = vmul.f32 1.442695, %v1639_v54 }
 0x3b5   : > { %3517 = vpow2.f32 %v1648_v56 }
 0x3b7   : > { %v3516_v57 = vpop.eup %3515 }
 0x3b8   : > { %v1662_v41 = vsel %vm1613_vm4, %v3516_v57, 0.0 }
 0x3b9   : > { %1663 = vadd.xlane.f32.xlu0 %v1662_v41 }
 0x3bf   : > { %v3518_v58 = vpop.eup %3517 }
 0x3c0   : > { %v1665_v59 = vsel %vm1613_vm4, %v3518_v58, 0.0 }
 0x3c1   : > { %1666 = vadd.xlane.f32.xlu1 %v1665_v59 }
 0x41f   : > { %v1622_v48 = vpop.xlane.xlu0 %1621 }
 0x420   : > { %v1640_v60 = vsub.f32 %v1607_v8, %v1622_v48 }
 0x422   : > { %v1650_v61 = vmul.f32 1.442695, %v1640_v60 }
 0x423   : > { %v1628_v62 = vpop.xlane.xlu0 %1627 }
 0x424   : > { %3519 = vpow2.f32 %v1650_v61  ;;  %v1642_v63 = vsub.f32 %v4574_v10, %v1628_v62 }
 0x426   : > { %v1654_v0 = vmul.f32 1.442695, %v1642_v63 }
 0x427   : > { %v1625_v1 = vpop.xlane.xlu1 %1624  ;;  %v1634_v55 = vpop.xlane.xlu0 %1633 }
 0x428   : > { %3521 = vpow2.f32 %v1654_v0  ;;  %v1641_v2 = vsub.f32 %v1608_v25, %v1625_v1  ;;  %v1644_v3 = vsub.f32 %v1611_v24, %v1634_v55 }
 0x42a   : > { %v1652_v4 = vmul.f32 1.442695, %v1641_v2  ;;  %v1658_v9 = vmul.f32 1.442695, %v1644_v3 }
 0x42c   : > { %3523 = vpow2.f32 %v1652_v4 }
 0x42d   : > { %3525 = vpow2.f32 %v1658_v9 }
 0x42e   : > { %v3520_v11 = vpop.eup %3519 }
 0x42f   : > { %v1668_v12 = vsel %vm1613_vm4, %v3520_v11, 0.0  ;;  %v1631_v17 = vpop.xlane.xlu1 %1630 }
 0x430   : > { %1669 = vadd.xlane.f32.xlu0 %v1668_v12  ;;  %v1643_v24 = vsub.f32 %v4583_v39, %v1631_v17 }
 0x432   : > { %v4598_v8 = vpop.eup %3521  ;;  %v1656_v28 = vmul.f32 1.442695, %v1643_v24  ;;  %v3467_v24 = vld [vmem:[%s4373_s15] sm:$0xff]  }
 0x433   : > { %v1674_v13 = vsel %vm1613_vm4, %v4598_v8, 0.0 }
 0x434   : > { %1675 = vadd.xlane.f32.xlu0 %v1674_v13 }
 0x436   : > { %v3524_v10 = vpop.eup %3523 }
 0x437   : > { %v4602_v14 = vpop.eup %3525  ;;  %v1671_v15 = vsel %vm1613_vm4, %v3524_v10, 0.0  ;;  %v1637_v19 = vpop.xlane.xlu1 %1636 }
 0x438   : > { %1672 = vadd.xlane.f32.xlu1 %v1671_v15  ;;  %v1680_v16 = vsel %vm1613_vm4, %v4602_v14, 0.0  ;;  %v1645_v29 = vsub.f32 %v4588_v50, %v1637_v19 }
 0x439   : > { %1681 = vadd.xlane.f32.xlu0 %v1680_v16 }
 0x43a   : > { %v1660_v35 = vmul.f32 1.442695, %v1645_v29  ;;  %v3469_v29 = vld [vmem:[%s4373_s15 + $0x10] sm:$0xff]  }
 0x446   : > { %v1664_v18 = vpop.xlane.xlu0 %1663 }
 0x447   : > { %3527 = vrcp.f32 %v1664_v18 }
 0x449   : > { %1134 = vrot.lane.b32.xlu1 %v4522_v7, %s3923_s21 }
 0x44e   : > { %v1667_v20 = vpop.xlane.xlu1 %1666 }
 0x44f   : > { %3529 = vrcp.f32 %v1667_v20  ;;  %1132 = vrot.lane.b32.xlu0 %v4522_v7, %s3924_s1 }
 0x450   : > { %3531 = vpow2.f32 %v1656_v28 }
 0x451   : > { %v3528_v21 = vpop.eup %3527  ;;  %3533 = vpow2.f32 %v1660_v35 }
 0x452   : > { %v1694_v22 = vmul.f32 %v3528_v21, %v3516_v57 }
 0x454   : > { %v1702_v23 = vpack.c.bf16 %v1694_v22, %v1694_v22 }
 0x456   : > { %3241 = vmatmul.mubr.msk.bf16.vlgmr.msra.gmra.mrb[12].mxu0 %vm1613_vm4, %v1702_v23 }
 0x457   : > { %3252 = vmatprep.mubr.msk.bf16.mxu0 %vm3922_vm0, %v3921_v6 }
 0x459   : > { %v3530_v25 = vpop.eup %3529 }
 0x45a   : > { %v1695_v26 = vmul.f32 %v3530_v25, %v3518_v58  ;;  %v3532_v36 = vpop.eup %3531  ;;  %v3468_v25 = vld [vmem:[%s4373_s15 + $0x8] sm:$0xff]  }
 0x45b   : > { %v1677_v37 = vsel %vm1613_vm4, %v3532_v36, 0.0  ;;  %v4620_v38 = vpop.eup %3533 }
 0x45c   : > { %v1703_v33 = vpack.c.bf16 %v1695_v26, %v1695_v26  ;;  %v1683_v39 = vsel %vm1613_vm4, %v4620_v38, 0.0 }
 0x45e   : > { %3247 = vmatmul.mubr.msk.bf16.vlgmr.msra.gmra.mrb[28].mxu1 %vm1613_vm4, %v1703_v33 }
 0x45f   : > { %3258 = vmatprep.mubr.msk.bf16.mxu1 %vm3922_vm0, %v3921_v6 }
 0x46d   : > { %1678 = vadd.xlane.f32.xlu1 %v1677_v37 }
 0x471   : > { %1684 = vadd.xlane.f32.xlu1 %v1683_v39  ;;  %v3470_v39 = vld [vmem:[%s4373_s15 + $0x18] sm:$0xff]  }
 0x482   : > { %1136 = vrot.lane.b32.xlu1 %v4522_v7, %s3925_s20 }
 0x4bd   : > { %v1670_v40 = vpop.xlane.xlu0 %1669 }
 0x4be   : > { %3535 = vrcp.f32 %v1670_v40 }
 0x4c1   : > { %v1676_v42 = vpop.xlane.xlu0 %1675 }
 0x4c2   : > { %3537 = vrcp.f32 %v1676_v42 }
 0x4c5   : > { %v1673_v43 = vpop.xlane.xlu1 %1672 }
 0x4c6   : > { %3539 = vrcp.f32 %v1673_v43  ;;  %v1682_v44 = vpop.xlane.xlu0 %1681 }
 0x4c7   : > { %3541 = vrcp.f32 %v1682_v44 }
 0x4c8   : > { %v3536_v45 = vpop.eup %3535 }
 0x4c9   : > { %v1135_v46 = vpop.permute.xlu1 %1134  ;;  %v1696_v49 = vmul.f32 %v3536_v45, %v3520_v11  ;;  %v3471_v45 = vld [vmem:[%s4373_s15 + $0x20] sm:$0xff]  }
 0x4ca   : > { %v1133_v47 = vpop.permute.xlu0 %1132  ;;  %v3013_v30 = vcombine.low %v1135_v46, %v1135_v46  ;;  %v3014_v41 = vcombine.high %v1135_v46, %v1135_v46 }
 0x4cb   : > { %v3011_v50 = vcombine.low %v1133_v47, %v1133_v47  ;;  %v3012_v51 = vcombine.high %v1133_v47, %v1133_v47  ;;  %v1704_v54 = vpack.c.bf16 %v1696_v49, %v1696_v49  ;;  %v3472_v47 = vld [vmem:[%s4373_s15 + $0x28] sm:$0xff]   ;;  %v3473_v49 = vld [vmem:[%s4373_s15 + $0x30] sm:$0xff]  }
 0x4cc   : > { %v3538_v7 = vpop.eup %3537  ;;  %v1899_v58 = vsel %vm1713_vm2, %v3013_v30, 0  ;;  %v1945_v60 = vsel %vm1713_vm2, %v3014_v41, 0 }
 0x4cd   : > { %v1807_v52 = vsel %vm1713_vm2, %v3011_v50, 0  ;;  %v1853_v53 = vsel %vm1713_vm2, %v3012_v51, 0  ;;  %v1698_v59 = vmul.f32 %v3538_v7, %v4598_v8  ;;  %v3474_v51 = vld [vmem:[%s4373_s15 + $0x38] sm:$0xff]  }
 0x4ce   : > { %3251 = vmatpush3.bf16.msra.mxu0 %v1807_v52  ;;  %3257 = vmatpush3.bf16.msra.mxu1 %v1853_v53 }
 0x4cf   : > { %3262 = vmatprep.subr.bf16.mxu0 %v3921_v6  ;;  %3268 = vmatprep.subr.bf16.mxu1 %v3921_v6  ;;  %v1706_v61 = vpack.c.bf16 %v1698_v59, %v1698_v59 }
 0x4d0   : > { %v3540_v56 = vpop.eup %3539 }
 0x4d1   : > { %v1697_v57 = vmul.f32 %v3540_v56, %v3524_v10  ;;  %3253 = vmatmul.mubr.msk.bf16.vlgmr.msra.gmra.mrb[16].mxu0 %vm1613_vm4, %v1704_v54  ;;  %v3542_v0 = vpop.eup %3541 }
 0x4d2   : > { %3263 = vmatpush3.bf16.msra.mxu0 %v1899_v58  ;;  %3264 = vmatprep.mubr.msk.bf16.mxu0 %vm3922_vm0, %v3921_v6  ;;  %v1700_v55 = vmul.f32 %v3542_v0, %v4602_v14 }
 0x4d3   : > { %v1705_v48 = vpack.c.bf16 %v1697_v57, %v1697_v57  ;;  %3274 = vmatprep.subr.bf16.mxu0 %v3921_v6 }
 0x4d4   : > { %v1708_v12 = vpack.c.bf16 %v1700_v55, %v1700_v55 }
 0x4d5   : > { %3259 = vmatmul.mubr.msk.bf16.vlgmr.msra.gmra.mrb[32].mxu1 %vm1613_vm4, %v1705_v48 }
 0x4d6   : > { %3269 = vmatpush3.bf16.msra.mxu1 %v1945_v60  ;;  %3270 = vmatprep.mubr.msk.bf16.mxu1 %vm3922_vm0, %v3921_v6 }
 0x4d7   : > { %3280 = vmatprep.subr.bf16.mxu1 %v3921_v6 }
 0x4d9   : > { %3265 = vmatmul.mubr.msk.bf16.vlgmr.msra.gmra.mrb[20].mxu0 %vm1613_vm4, %v1706_v61 }
 0x4da   : > { %3276 = vmatprep.mubr.msk.bf16.mxu0 %vm3922_vm0, %v3921_v6 }
 0x4fa   : > { %v1679_v62 = vpop.xlane.xlu1 %1678 }
 0x4fb   : > { %3543 = vrcp.f32 %v1679_v62 }
 0x4fe   : > { %v1685_v63 = vpop.xlane.xlu1 %1684 }
 0x4ff   : > { %3545 = vrcp.f32 %v1685_v63 }
 0x502   : > { %v1137_v1 = vpop.permute.xlu1 %1136 }
 0x503   : > { %v3015_v2 = vcombine.low %v1137_v1, %v1137_v1  ;;  %v3016_v11 = vcombine.high %v1137_v1, %v1137_v1 }
 0x505   : > { %v3544_v3 = vpop.eup %3543  ;;  %v1991_v4 = vsel %vm1713_vm2, %v3015_v2, 0  ;;  %v2037_v10 = vsel %vm1713_vm2, %v3016_v11, 0 }
 0x506   : > { %v1699_v9 = vmul.f32 %v3544_v3, %v3532_v36  ;;  %3275 = vmatpush3.bf16.msra.mxu0 %v1991_v4 }
 0x507   : > { %3286 = vmatprep.subr.bf16.mxu0 %v3921_v6 }
 0x508   : > { %v1707_v8 = vpack.c.bf16 %v1699_v9, %v1699_v9 }
 0x509   : > { %v3546_v13 = vpop.eup %3545  ;;  %3277 = vmatmul.mubr.msk.bf16.vlgmr.msra.gmra.mrb[24].mxu0 %vm1613_vm4, %v1708_v12 }
 0x50a   : > { %3271 = vmatmul.mubr.msk.bf16.vlgmr.msra.gmra.mrb[36].mxu1 %vm1613_vm4, %v1707_v8  ;;  %3302 = vmatprep.mubr.msk.bf16.mxu0 %vm3922_vm0, %v3921_v6  ;;  %v1701_v14 = vmul.f32 %v3546_v13, %v4620_v38 }
 0x50b   : > { %3281 = vmatpush3.bf16.msra.mxu1 %v2037_v10  ;;  %3282 = vmatprep.mubr.msk.bf16.mxu1 %vm3922_vm0, %v3921_v6 }
 0x50c   : > { %v1709_v15 = vpack.c.bf16 %v1701_v14, %v1701_v14  ;;  %3287 = vmatpush3.bf16.msra.mxu0 %v3467_v24 }
 0x50d   : > { %3288 = vmatprep.subr.bf16.mxu0 %v3921_v6 }
 0x510   : > { %3289 = vmatpush3.bf16.msra.mxu0 %v3468_v25 }
 0x511   : > { %3290 = vmatprep.subr.bf16.mxu0 %v3921_v6 }
 0x512   : > { %3283 = vmatmul.mubr.msk.bf16.vlgmr.msra.gmra.mrb[40].mxu1 %vm1613_vm4, %v1709_v15  ;;  %v3041_v15 = vld [vmem:[%s796_s0] ss:$0 sm:$0xff] }
 0x513   : > { %2420 = vmatprep.mubr.bf16.mxu1 %v3920_v5 }
 0x514   : > { %3291 = vmatpush3.bf16.msra.mxu0 %v3469_v29 }
 0x515   : > { %3292 = vmatprep.subr.bf16.mxu0 %v3921_v6 }
 0x518   : > { %3293 = vmatpush3.bf16.msra.mxu0 %v3470_v39 }
 0x519   : > { %3294 = vmatprep.subr.bf16.mxu0 %v3921_v6 }
 0x51c   : > { %3295 = vmatpush3.bf16.msra.mxu0 %v3471_v45 }
 0x51d   : > { %3296 = vmatprep.subr.bf16.mxu0 %v3921_v6 }
 0x520   : > { %3297 = vmatpush3.bf16.msra.mxu0 %v3472_v47 }
 0x521   : > { %3298 = vmatprep.subr.bf16.mxu0 %v3921_v6 }
 0x524   : > { %3299 = vmatpush3.bf16.msra.mxu0 %v3473_v49 }
 0x525   : > { %3300 = vmatprep.subr.bf16.mxu0 %v3921_v6 }
 0x528   : > { %3301 = vmatpush3.bf16.msra.mxu0 %v3474_v51  ;;  %v3477_v51 = vld [vmem:[%s4381_s28 + $0x4] ss:$8 sps:$4 sm:$0xff]  }
 0x529   : > { %v4657_v16 = vpop.f32.mrb[12].mxu0  ;;  %2388 = vmatprep.subr.bf16.mxu1 %v3477_v51  ;;  %v2296_v51 = vld [vmem:[%s4383_s7] sm:$0x3]  ;;  %s4875_s7 = scalar_lea.vmem [#allocation15], %s4360_s29 }
 0x52a   : > { %v3242_v17 = vpop.f32.mrb[13].mxu0  ;;  %v3066_v31 = vld [vmem:[%s4875_s7] ss:$0 sm:$0xff] }
 0x52b   : > { %v1754_v18 = vpop.f32.mrb[14].mxu0  ;;  %v819_v17 = vunpack.c.l.bf16 %v4454_v27 }
 0x52c   : > { %v3243_v19 = vpop.f32.mrb[15].mxu0 }
 0x531   : > { %v4659_v20 = vpop.f32.mrb[28].mxu1 }
 0x532   : > { %v3248_v21 = vpop.f32.mrb[29].mxu1 }
 0x533   : > { %v1800_v22 = vpop.f32.mrb[30].mxu1 }
 0x534   : > { %v3249_v23 = vpop.f32.mrb[31].mxu1 }
 0x5a4   : > { %v1843_v26 = vpop.f32.mrb[16].mxu0 }
 0x5a5   : > { %v3254_v28 = vpop.f32.mrb[17].mxu0 }
 0x5a6   : > { %v1846_v5 = vpop.f32.mrb[18].mxu0 }
 0x5a7   : > { %v3255_v33 = vpop.f32.mrb[19].mxu0 }
 0x5a8   : > { %v1889_v35 = vpop.f32.mrb[32].mxu1 }
 0x5a9   : > { %v3420_v36 = vpack.i.bf16 %v1889_v35, %v1843_v26  ;;  %v3260_v37 = vpop.f32.mrb[33].mxu1 }
 0x5aa   : > { %v1892_v38 = vpop.f32.mrb[34].mxu1 }
 0x5ab   : > { %v3261_v40 = vpop.f32.mrb[35].mxu1  ;;  %3421 = vrot.lane.b32.xlu0 %v3420_v36, %s3925_s20 }
 0x5ac   : > { %v1935_v42 = vpop.f32.mrb[20].mxu0 }
 0x5ad   : > { %v3266_v43 = vpop.f32.mrb[21].mxu0 }
 0x5ae   : > { %v1938_v44 = vpop.f32.mrb[22].mxu0 }
 0x5af   : > { %v3267_v46 = vpop.f32.mrb[23].mxu0 }
 0x5dc   : > { %v2027_v50 = vpop.f32.mrb[24].mxu0 }
 0x5dd   : > { %v1981_v30 = vpop.f32.mrb[36].mxu1  ;;  %v3278_v52 = vpop.f32.mrb[25].mxu0 }
 0x5de   : > { %v3425_v53 = vpack.i.bf16 %v1981_v30, %v1935_v42  ;;  %v3272_v7 = vpop.f32.mrb[37].mxu1  ;;  %v2030_v54 = vpop.f32.mrb[26].mxu0  ;;  %v3475_v30 = vld [vmem:[%s4381_s28] ss:$8 sps:$4 sm:$0xff]   ;;  %v3480_v52 = vld [vmem:[%s4381_s28 + $0x14] ss:$8 sps:$4 sm:$0xff]  }
 0x5df   : > { %v1984_v56 = vpop.f32.mrb[38].mxu1  ;;  %v3279_v57 = vpop.f32.mrb[27].mxu0  ;;  %2389 = vmatpush1.bf16.msra.mxu1 %v3475_v30  ;;  %v3483_v7 = vld [vmem:[%s4381_s28 + $0x24] ss:$8 sps:$4 sm:$0xff]   ;;  %v3481_v54 = vld [vmem:[%s4381_s28 + $0x20] ss:$8 sps:$4 sm:$0xff]   ;;  %v2301_v30 = vrot.slane %v2296_v51, %v857_v34 }
 0x5e0   : > { %v3273_v41 = vpop.f32.mrb[39].mxu1  ;;  %3426 = vrot.lane.b32.xlu1 %v3425_v53, %s3923_s21  ;;  %v3478_v53 = vld [vmem:[%s4381_s28 + $0x10] ss:$8 sps:$4 sm:$0xff]   ;;  %2390 = vmatprep.subr.bf16.mxu1 %v3480_v52  ;;  %v3486_v56 = vld [vmem:[%s4381_s28 + $0x34] ss:$8 sps:$4 sm:$0xff]   ;;  %v2305_v52 = vrot.slane %v2296_v51, %v861_v32 }
 0x5e1   : > { %v3484_v57 = vld [vmem:[%s4381_s28 + $0x30] ss:$8 sps:$4 sm:$0xff]   ;;  %v3489_v41 = vld [vmem:[%s4381_s28 + $0x44] ss:$8 sps:$4 sm:$0xff]  }
 0x5e3   : > { %2391 = vmatpush1.bf16.msra.mxu1 %v3478_v53 }
 0x5e4   : > { %2392 = vmatprep.subr.bf16.mxu1 %v3483_v7 }
 0x5e5   : > { %v2073_v58 = vpop.f32.mrb[40].mxu1 }
 0x5e6   : > { %v3430_v59 = vpack.i.bf16 %v2073_v58, %v2027_v50  ;;  %v3284_v48 = vpop.f32.mrb[41].mxu1  ;;  %v3487_v58 = vld [vmem:[%s4381_s28 + $0x40] ss:$8 sps:$4 sm:$0xff]  }
 0x5e7   : > { %v2076_v60 = vpop.f32.mrb[42].mxu1  ;;  %2393 = vmatpush1.bf16.msra.mxu1 %v3481_v54  ;;  %v3490_v48 = vld [vmem:[%s4381_s28 + $0x50] ss:$8 sps:$4 sm:$0xff]  }
 0x5e8   : > { %v3285_v61 = vpop.f32.mrb[43].mxu1  ;;  %3431 = vrot.lane.b32.xlu0 %v3430_v59, %s3924_s1  ;;  %2394 = vmatprep.subr.bf16.mxu1 %v3486_v56  ;;  %v3492_v59 = vld [vmem:[%s4381_s28 + $0x54] ss:$8 sps:$4 sm:$0xff]   ;;  %v3495_v60 = vld [vmem:[%s4381_s28 + $0x64] ss:$8 sps:$4 sm:$0xff]  }
 0x5e9   : > { %v3493_v61 = vld [vmem:[%s4381_s28 + $0x60] ss:$8 sps:$4 sm:$0xff]  }
 0x5eb   : > { %2395 = vmatpush1.bf16.msra.mxu1 %v3484_v57 }
 0x5ec   : > { %2396 = vmatprep.subr.bf16.mxu1 %v3489_v41 }
 0x5ef   : > { %2397 = vmatpush1.bf16.msra.mxu1 %v3487_v58 }
 0x5f0   : > { %2398 = vmatprep.subr.bf16.mxu1 %v3492_v59 }
 0x5f3   : > { %2399 = vmatpush1.bf16.msra.mxu1 %v3490_v48 }
 0x5f4   : > { %2400 = vmatprep.subr.bf16.mxu1 %v3495_v60 }
 0x5f7   : > { %2401 = vmatpush1.bf16.msra.mxu1 %v3493_v61 }
 0x61d   : > { %v3422_v6 = vpop.permute.xlu0 %3421 }
 0x61e   : > { %v3424_v63 = vunpack.i.h.bf16 %v3422_v6  ;;  %v3423_v0 = vunpack.i.l.bf16 %v3422_v6  ;;  %v3498_v6 = vld [vmem:[%s4381_s28 + $0x74] ss:$8 sps:$4 sm:$0xff]  }
 0x61f   : > { %2402 = vmatprep.subr.bf16.mxu1 %v3498_v6 }
 0x620   : > { %v2104_v3 = vsel %vm1154_vm1, %v4659_v20, %v3424_v63  ;;  %v2103_v4 = vsel %vm1154_vm1, %v4657_v16, %v3423_v0  ;;  %v820_v16 = vunpack.c.h.bf16 %v4454_v27  ;;  %v3499_v63 = vld [vmem:[%s4389_s11 + $0x40] sm:$0xff]  }
 0x621   : > { %v3500_v0 = vld [vmem:[%s4389_s11] sm:$0xff]   ;;  %3148 = vmatprep.subr.bf16.mxu0 %v3499_v63 }
 0x652   : > { %v3427_v62 = vpop.permute.xlu1 %3426 }
 0x653   : > { %v3429_v1 = vunpack.i.h.bf16 %v3427_v62  ;;  %v3428_v55 = vunpack.i.l.bf16 %v3427_v62  ;;  %v3496_v62 = vld [vmem:[%s4381_s28 + $0x70] ss:$8 sps:$4 sm:$0xff]  }
 0x654   : > { %2403 = vmatpush1.bf16.msra.mxu1 %v3496_v62 }
 0x655   : > { %v2107_v12 = vsel %vm2105_vm12, %v2104_v3, %v3429_v1  ;;  %v2106_v8 = vsel %vm2105_vm12, %v2103_v4, %v3428_v55  ;;  %v3501_v1 = vld [vmem:[%s4389_s11 + $0x48] sm:$0xff]   ;;  %v3504_v3 = vld [vmem:[%s4389_s11 + $0x10] sm:$0xff]   ;;  %v3505_v4 = vld [vmem:[%s4389_s11 + $0x58] sm:$0xff]  }
 0x656   : > { %v3502_v55 = vld [vmem:[%s4389_s11 + $0x8] sm:$0xff]  }
 0x65a   : > { %v3432_v2 = vpop.permute.xlu0 %3431 }
 0x65b   : > { %v3434_v9 = vunpack.i.h.bf16 %v3432_v2  ;;  %v3433_v11 = vunpack.i.l.bf16 %v3432_v2  ;;  %v3503_v2 = vld [vmem:[%s4389_s11 + $0x50] sm:$0xff]  }
 0x65d   : > { %v2110_v13 = vsel %vm2108_vm13, %v2107_v12, %v3434_v9  ;;  %v2109_v10 = vsel %vm2108_vm13, %v2106_v8, %v3433_v11  ;;  %v3506_v9 = vld [vmem:[%s4389_s11 + $0x18] sm:$0xff]   ;;  %v3507_v11 = vld [vmem:[%s4389_s11 + $0x60] sm:$0xff]   ;;  %v3509_v8 = vld [vmem:[%s4389_s11 + $0x68] sm:$0xff]  }
 0x65e   : > { %v2111_v14 = vpack.c.bf16 %v2110_v13, %v2109_v10  ;;  %v3508_v12 = vld [vmem:[%s4389_s11 + $0x20] sm:$0xff]  }
 0x660   : > { %3303 = vmatmul.mubr.bf16.vlgmr.msra.gmra.mrb[28].mxu0 %v2111_v14 }
 0x661   : > { %3149 = vmatpush3.bf16.msra.mxu0 %v3500_v0 }
 0x662   : > { %3150 = vmatprep.subr.bf16.mxu0 %v3501_v1 }
 0x665   : > { %3151 = vmatpush3.bf16.msra.mxu0 %v3502_v55 }
 0x666   : > { %3152 = vmatprep.subr.bf16.mxu0 %v3503_v2 }
 0x669   : > { %3153 = vmatpush3.bf16.msra.mxu0 %v3504_v3 }
 0x66a   : > { %3154 = vmatprep.subr.bf16.mxu0 %v3505_v4 }
 0x66d   : > { %3155 = vmatpush3.bf16.msra.mxu0 %v3506_v9 }
 0x66e   : > { %3156 = vmatprep.subr.bf16.mxu0 %v3507_v11 }
 0x671   : > { %3157 = vmatpush3.bf16.msra.mxu0 %v3508_v12 }
 0x672   : > { %3158 = vmatprep.subr.bf16.mxu0 %v3509_v8 }
 0x733   : > { %v2217_v18 = vpop.f32.mrb[28].mxu0 }
 0x734   : > { %v2218_v19 = vadd.f32 %v3041_v15, %v2217_v18  ;;  %v3304_v20 = vpop.f32.mrb[29].mxu0 }
 0x735   : > { %v2220_v21 = vpop.f32.mrb[30].mxu0 }
 0x736   : > { %v2221_v22 = vadd.f32 %v3041_v15, %v2220_v21  ;;  %v3305_v23 = vpop.f32.mrb[31].mxu0  ;;  %v2224_v24 = vadd.f32 %v2218_v19, %v819_v17 }
 0x738   : > { %2226 = vadd.xlane.f32.xlu1 %v2224_v24  ;;  %v2225_v25 = vadd.f32 %v2221_v22, %v820_v16 }
 0x73a   : > { %2228 = vadd.xlane.f32.xlu0 %v2225_v25 }
 0x7c5   : > { %v2227_v26 = vpop.xlane.xlu1 %2226 }
 0x7c6   : > { %v2230_v28 = vrot.slane %v2227_v26, 4 }
 0x7c7   : > { %v2229_v5 = vpop.xlane.xlu0 %2228 }
 0x7c8   : > { %v2231_v29 = vadd.f32 %v2230_v28, %v2227_v26  ;;  %v2236_v33 = vrot.slane %v2229_v5, 4 }
 0x7ca   : > { %v2232_v35 = vrot.slane %v2231_v29, 2  ;;  %v2237_v36 = vadd.f32 %v2236_v33, %v2229_v5 }
 0x7cc   : > { %v2233_v37 = vadd.f32 %v2232_v35, %v2231_v29  ;;  %v2238_v38 = vrot.slane %v2237_v36, 2  ;;  %v2273_v35 = vld [vmem:[%s800_s18] sm:$0xff]  ;;  %s4876_s18 = sld [smem:[#allocation37_spill]] }
 0x7ce   : > { %v2234_v39 = vrot.slane %v2233_v37, 1  ;;  %v2239_v27 = vadd.f32 %v2238_v38, %v2237_v36 }
 0x7d0   : > { %v2235_v40 = vadd.f32 %v2234_v39, %v2233_v37  ;;  %v2240_v42 = vrot.slane %v2239_v27, 1 }
 0x7d2   : > { %v2241_v43 = vadd.f32 %v2240_v42, %v2239_v27  ;;  %v2243_v44 = vmul.f32 0.0009765625, %v2235_v40  ;;  %v2276_v27 = vld [vmem:[%s804_s26] sm:$0xff]  ;;  %s4877_s26 = scalar_lea.vmem %s4876_s18, %s4406_s17 }
 0x7d4   : > { %v4690_v45 = vsub.f32 %v2224_v24, %v2243_v44  ;;  %v2244_v46 = vmul.f32 0.0009765625, %v2241_v43 }
 0x7d6   : > { %v2247_v47 = vmul.f32 %v4690_v45, %v4690_v45  ;;  %v4694_v49 = vsub.f32 %v2225_v25, %v2244_v46  ;;  %v3510_v46 = vld [vmem:[%s4389_s11 + $0x28] sm:$0xff]  }
 0x7d7   : > { %3159 = vmatpush3.bf16.msra.mxu0 %v3510_v46 }
 0x7d8   : > { %2249 = vadd.xlane.f32.xlu0 %v2247_v47  ;;  %v2248_v50 = vmul.f32 %v4694_v49, %v4694_v49  ;;  %v3512_v47 = vld [vmem:[%s4389_s11 + $0x30] sm:$0xff]  }
 0x7da   : > { %2251 = vadd.xlane.f32.xlu1 %v2248_v50  ;;  %v3513_v50 = vld [vmem:[%s4389_s11 + $0x78] sm:$0xff]  }
 0x865   : > { %v2250_v13 = vpop.xlane.xlu0 %2249 }
 0x866   : > { %v2253_v10 = vrot.slane %v2250_v13, 4 }
 0x867   : > { %v2252_v14 = vpop.xlane.xlu1 %2251 }
 0x868   : > { %v2254_v15 = vadd.f32 %v2253_v10, %v2250_v13  ;;  %v2259_v17 = vrot.slane %v2252_v14, 4 }
 0x86a   : > { %v2255_v18 = vrot.slane %v2254_v15, 2  ;;  %v2260_v19 = vadd.f32 %v2259_v17, %v2252_v14 }
 0x86c   : > { %v2256_v20 = vadd.f32 %v2255_v18, %v2254_v15  ;;  %v2261_v16 = vrot.slane %v2260_v19, 2 }
 0x86e   : > { %v2257_v21 = vrot.slane %v2256_v20, 1  ;;  %v2262_v22 = vadd.f32 %v2261_v16, %v2260_v19 }
 0x870   : > { %v2258_v23 = vadd.f32 %v2257_v21, %v2256_v20  ;;  %v2263_v24 = vrot.slane %v2262_v22, 1 }
 0x872   : > { %v2265_v25 = vmul.f32 0.0009765625, %v2258_v23  ;;  %v2264_v26 = vadd.f32 %v2263_v24, %v2262_v22 }
 0x874   : > { %v2267_v28 = vadd.f32 1e-05, %v2265_v25  ;;  %v2266_v5 = vmul.f32 0.0009765625, %v2264_v26 }
 0x876   : > { %3547 = vrsqrt.f32 %v2267_v28  ;;  %v2268_v29 = vadd.f32 1e-05, %v2266_v5 }
 0x878   : > { %3549 = vrsqrt.f32 %v2268_v29 }
 0x880   : > { %v3548_v33 = vpop.eup %3547 }
 0x881   : > { %v2271_v36 = vmul.f32 %v3548_v33, %v4690_v45  ;;  %v3511_v45 = vld [vmem:[%s4389_s11 + $0x70] sm:$0xff]  }
 0x882   : > { %v3550_v37 = vpop.eup %3549  ;;  %3160 = vmatprep.subr.bf16.mxu0 %v3511_v45 }
 0x883   : > { %v2272_v38 = vmul.f32 %v3550_v37, %v4694_v49  ;;  %v2274_v39 = vmul.f32 %v2273_v35, %v2271_v36  ;;  %3161 = vmatpush3.bf16.msra.mxu0 %v3512_v47  ;;  %v3514_v49 = vld [vmem:[%s4389_s11 + $0x38] sm:$0xff]  }
 0x884   : > { %3162 = vmatprep.subr.bf16.mxu0 %v3513_v50 }
 0x885   : > { %v2275_v40 = vmul.f32 %v2273_v35, %v2272_v38  ;;  %v2277_v42 = vadd.f32 %v2276_v27, %v2274_v39 }
 0x887   : > { %v2278_v43 = vadd.f32 %v2276_v27, %v2275_v40  ;;  %3163 = vmatpush3.bf16.msra.mxu0 %v3514_v49 }
 0x889   : > { %v2279_v44 = vpack.c.bf16 %v2278_v43, %v2277_v42 }
 0x88b   : > { %2421 = vmatmul.mubr.bf16.vlgmr.msra.gmra.mrb[44].mxu1 %v2279_v44 }
 0x95e   : > { %v2422_v53 = vpop.f32.mrb[44].mxu1 }
 0x95f   : > { %v2423_v7 = vadd.f32 %v2422_v53, %v2301_v30  ;;  %v2424_v54 = vpop.f32.mrb[45].mxu1  ;;  %v2661_v53 = vld [vmem:[%s4877_s26] sm:$0xff] }
 0x960   : > { %v2425_v56 = vadd.f32 %v2424_v54, %v2305_v52  ;;  %v2426_v57 = vpop.f32.mrb[46].mxu1 }
 0x961   : > { %v2427_v41 = vadd.f32 %v2426_v57, %v2301_v30  ;;  %v2428_v58 = vpop.f32.mrb[47].mxu1  ;;  %v2431_v48 = vmax.f32 %v2423_v7, 0.0 }
 0x962   : > { %v2429_v59 = vadd.f32 %v2428_v58, %v2305_v52  ;;  %v2432_v61 = vmax.f32 %v2425_v56, 0.0 }
 0x963   : > { %v2433_v60 = vmax.f32 %v2427_v41, 0.0  ;;  %v2664_v41 = vld [vmem:[%s4420_s10] sm:$0xff] }
 0x964   : > { %v2434_v6 = vmax.f32 %v2429_v59, 0.0 }
 0x965   : > { %v2435_v62 = vpack.c.bf16 %v2433_v60, %v2431_v48 }
 0x966   : > { %v2436_v63 = vpack.c.bf16 %v2434_v6, %v2432_v61 }
 0x968   : > { %2604 = vmatprep.mubr.bf16.mxu0 %v2436_v63 }
 0x969   : > { %2605 = vmatmul.mubr.bf16.vlgmr.msra.gmra.mrb[32].mxu0 %v2435_v62 }
 0xa3c   : > { %v3164_v34 = vpop.f32.mrb[32].mxu0 }
 0xa3d   : > { %v3165_v32 = vpop.f32.mrb[33].mxu0 }
 0xa3e   : > { %v3166_v0 = vadd.f32 %v3165_v32, %v3164_v34  ;;  %v3167_v1 = vpop.f32.mrb[34].mxu0 }
 0xa3f   : > { %v3168_v55 = vpop.f32.mrb[35].mxu0 }
 0xa40   : > { %v2607_v2 = vadd.f32 %v3166_v0, %v3066_v31  ;;  %v3169_v3 = vadd.f32 %v3168_v55, %v3167_v1 }
 0xa42   : > { %v2610_v4 = vadd.f32 %v3169_v3, %v3066_v31  ;;  %v2613_v9 = vadd.f32 %v2607_v2, %v2277_v42 }
 0xa44   : > { %2615 = vadd.xlane.f32.xlu0 %v2613_v9  ;;  %v2614_v11 = vadd.f32 %v2610_v4, %v2278_v43 }
 0xa46   : > { %2617 = vadd.xlane.f32.xlu1 %v2614_v11 }
 0xad1   : > { %v2616_v12 = vpop.xlane.xlu0 %2615 }
 0xad2   : > { %v2619_v8 = vrot.slane %v2616_v12, 4 }
 0xad3   : > { %v2618_v13 = vpop.xlane.xlu1 %2617 }
 0xad4   : > { %v2620_v10 = vadd.f32 %v2619_v8, %v2616_v12  ;;  %v2625_v14 = vrot.slane %v2618_v13, 4 }
 0xad6   : > { %v2621_v15 = vrot.slane %v2620_v10, 2  ;;  %v2626_v17 = vadd.f32 %v2625_v14, %v2618_v13 }
 0xad8   : > { %v2622_v18 = vadd.f32 %v2621_v15, %v2620_v10  ;;  %v2627_v19 = vrot.slane %v2626_v17, 2 }
 0xada   : > { %v2623_v20 = vrot.slane %v2622_v18, 1  ;;  %v2628_v16 = vadd.f32 %v2627_v19, %v2626_v17 }
 0xadc   : > { %v2624_v21 = vadd.f32 %v2623_v20, %v2622_v18  ;;  %v2629_v22 = vrot.slane %v2628_v16, 1 }
 0xade   : > { %v2630_v23 = vadd.f32 %v2629_v22, %v2628_v16  ;;  %v2631_v24 = vmul.f32 0.0009765625, %v2624_v21 }
 0xae0   : > { %v2633_v25 = vsub.f32 %v2613_v9, %v2631_v24  ;;  %v2632_v26 = vmul.f32 0.0009765625, %v2630_v23 }
 0xae2   : > { %v2635_v28 = vmul.f32 %v2633_v25, %v2633_v25  ;;  %v2634_v5 = vsub.f32 %v2614_v11, %v2632_v26 }
 0xae4   : > { %2637 = vadd.xlane.f32.xlu0 %v2635_v28  ;;  %v2636_v29 = vmul.f32 %v2634_v5, %v2634_v5 }
 0xae6   : > { %2639 = vadd.xlane.f32.xlu1 %v2636_v29 }
 0xb71   : > { %v2638_v33 = vpop.xlane.xlu0 %2637 }
 0xb72   : > { %v2641_v35 = vrot.slane %v2638_v33, 4 }
 0xb73   : > { %v2640_v36 = vpop.xlane.xlu1 %2639 }
 0xb74   : > { %v2642_v37 = vadd.f32 %v2641_v35, %v2638_v33  ;;  %v2647_v38 = vrot.slane %v2640_v36, 4 }
 0xb76   : > { %v2643_v39 = vrot.slane %v2642_v37, 2  ;;  %v2648_v27 = vadd.f32 %v2647_v38, %v2640_v36 }
 0xb78   : > { %v2644_v40 = vadd.f32 %v2643_v39, %v2642_v37  ;;  %v2649_v42 = vrot.slane %v2648_v27, 2 }
 0xb7a   : > { %v2645_v43 = vrot.slane %v2644_v40, 1  ;;  %v2650_v44 = vadd.f32 %v2649_v42, %v2648_v27 }
 0xb7c   : > { %v2646_v46 = vadd.f32 %v2645_v43, %v2644_v40  ;;  %v2651_v45 = vrot.slane %v2650_v44, 1 }
 0xb7e   : > { %v2653_v47 = vmul.f32 0.0009765625, %v2646_v46  ;;  %v2652_v50 = vadd.f32 %v2651_v45, %v2650_v44 }
 0xb80   : > { %v2655_v49 = vadd.f32 1e-05, %v2653_v47  ;;  %v2654_v51 = vmul.f32 0.0009765625, %v2652_v50 }
 0xb82   : > { %3551 = vrsqrt.f32 %v2655_v49  ;;  %v2656_v30 = vadd.f32 1e-05, %v2654_v51 }
 0xb84   : > { %3553 = vrsqrt.f32 %v2656_v30 }
 0xb8c   : > { %v3552_v52 = vpop.eup %3551 }
 0xb8d   : > { %v2659_v7 = vmul.f32 %v3552_v52, %v2633_v25 }
 0xb8e   : > { %v3554_v54 = vpop.eup %3553 }
 0xb8f   : > { %v2662_v56 = vmul.f32 %v2661_v53, %v2659_v7  ;;  %v2660_v57 = vmul.f32 %v3554_v54, %v2634_v5 }
 0xb91   : > { %v2663_v58 = vmul.f32 %v2661_v53, %v2660_v57  ;;  %v2665_v59 = vadd.f32 %v2664_v41, %v2662_v56  ;;  %2672 = sbr.rel (%p3083_p5) target bundleno = 2968 (0xb98), region = 120 }
 0xb93   : > { %v2666_v48 = vadd.f32 %v2664_v41, %v2663_v58  ;;  %2673 = vst [vmem:[#allocation18] sm:$0xff] (!%p3083_p5), %v2665_v59 }
 0xb95   : > { %v2667_v60 = vpack.c.bf16 %v2666_v48, %v2665_v59  ;;  %2674 = vst [vmem:[#allocation18 + $0x8] sm:$0xff] (!%p3083_p5), %v2666_v48 }
 0xb97   : > { %2668 = vst [vmem:[#allocation2] sm:$0xff] %v2667_v60 }
 0xb98 PF: > { %p3368_p8 = scmp.eq.s32.totalorder %s4177_s25, 1  ;;  %s3926_s17 = smov [#allocation18]  }
 0xb99   : > { %s2681_s23 = sshll.u32 %s3926_s17, 4  ;;  %s2682_s23 = int_to_ptr.vmem [resolvable:$true] %s2681_s23 }
 0xb9a   : > { %s3823_s4 = scalar_lea.vmem %s2682_s23, 256  ;;  %p3830_p7 = scmp.lt.s32.totalorder %s2682_s23, %s2682_s23 }
 0xb9b   : > { %p3824_p12 = scmp.ne.s32.totalorder %s2682_s23, %s3823_s4  ;;  %p3831_p0 = scmp.lt.s32.totalorder %s3823_s4, %s3823_s4 }
 0xb9d   : > { %p3825_p2 = pnand %p3824_p12, %p3368_p8  ;;  %p3832_p1 = por %p3831_p0, %p3830_p7 }
 0xb9f   : > { %p3826_p9 = pneg %p3825_p2 }
 0xba1   : > { %p3833_p6 = pnand %p3832_p1, %p3826_p9 }
 0xba3   : > { %3836 = shalt.err (!%p3833_p6)
}
 0xba4   : > { %s4878_s16 = sld [smem:[#allocation38_spill]] }
 0xbaa   : > { %s4879_s27 = smov %s4878_s16  ;;  %s3837_s2 = scalar_lea.hbm %s4878_s16, 256 }
 0xbab   : > { %p3838_p11 = scmp.ne.s32.totalorder %s4879_s27, %s3837_s2  ;;  %p3843_p3 = scmp.lt.u32.totalorder %s3837_s2, %s4879_s27 }
 0xbad   : > { %p3839_p4 = pnand %p3838_p11, %p3368_p8 }
 0xbaf   : > { %p3840_p13 = pneg %p3839_p4 }
 0xbb1   : > { %p3845_p10 = pnand %p3843_p3, %p3840_p13 }
 0xbb3   : > { %3848 = shalt.err (!%p3845_p10)
}
 0xbb4   : > { %s3927_s15 = smov 128   ;;  %s3928_s28 = smov 8  }
 0xbb5   : > { %3333 = dma.vmem_to_hbm [thread:$0]  (%p3368_p8), %s2682_s23, 256, %s4879_s27, [#allocation5], %s3927_s15, %s3927_s15, %s3928_s28  }
 0xbb6   : > { %3886 = dma.done.wait (%p3368_p8), [#allocation5], 256  }
 0xbb7   : > { %3888 = vsyncadd (%p3368_p8), [#allocation5], 4294967040 }
 0xbb8 PF: > { %s4880_s16 = sld [smem:[#allocation26_spill]]  ;;  %s4881_s21 = sld [smem:[#allocation25_spill]] }
 0xbb9   : > { %s4882_s15 = sld [smem:[#allocation27_spill]]  ;;  %s4883_s29 = smov %s3895_s30 }
 0xbbe   : > { %p35_p5 = scmp.ge.s32.totalorder %s4880_s16, 4   ;;  %s4884_s30 = smov %s4881_s21 }
 0xbc0   :  { %37 = sbr.rel (!%p35_p5) target bundleno = 23 (0x17), region = 221 }
 0xbc7   :  { %2697 = vsyncpa [#allocation4], 1 }
 0xbc8   :  { %2699 = vsyncpa [#allocation4 + $0x1], 1 }
 0xbc9   :  { %2700 = vsyncpa [#allocation7], 1 }
 0xbca   :  { %2702 = vsyncpa [#allocation7 + $0x1], 1 }
 0xbcb   :  { %2703 = vsyncpa [#allocation10], 1 }
 0xbcc   :  { %2705 = vsyncpa [#allocation10 + $0x1], 1 }
 0xbcd   :  { %2706 = vsyncpa [#allocation13], 1 }
 0xbce   :  { %2708 = vsyncpa [#allocation13 + $0x1], 1 }
 0xbcf   :  { %2709 = vsyncpa [#allocation16], 1 }
 0xbd0   :  { %2711 = vsyncpa [#allocation16 + $0x1], 1 }
 0xbd1   :  { %2712 = vsyncpa [#allocation5], 1 }
 0xbd2   :  { %2714 = vsyncpa [#allocation5 + $0x1], 1 }

</bundles_post_ra>
